<compile_context>
chip_gen: v6e
topology: v6e:2x2x1
jax: 0.10.0
libtpu: 0.0.40
codegen_flags: <defaults>
</compile_context>

<pallas_src>
import jax
import jax.numpy as jnp
from jax.experimental import pallas as pl
from jax.experimental.pallas import tpu as pltpu

_H1, _H2, _H3 = 128, 64, 32
_LANE = 128


def _mlp_kernel(x_ref,
                w1_ref, b1_ref,
                w2_ref, b2_ref,
                w3_ref, b3_ref,
                w4_ref, b4_ref,
                o_ref):
    cdt = w1_ref.dtype  # MXU operand dtype (bf16 or f32); accumulation is f32.

    # In-kernel cast of the f32 input tile (free on the VPU; keeps x HBM traffic f32-only once).
    x = x_ref[...].astype(cdt)

    # fc1 + ReLU
    h = jnp.dot(x, w1_ref[...], preferred_element_type=jnp.float32)
    h = jnp.maximum(h + b1_ref[...], 0.0)

    # fc2 + ReLU
    h = jnp.dot(h.astype(cdt), w2_ref[...], preferred_element_type=jnp.float32)
    h = jnp.maximum(h + b2_ref[...], 0.0)

    # fc3 + ReLU
    h = jnp.dot(h.astype(cdt), w3_ref[...], preferred_element_type=jnp.float32)
    h = jnp.maximum(h + b3_ref[...], 0.0)

    # fc4 (no activation); output block is lane-padded to 128 cols -> full-vreg stores.
    h = jnp.dot(h.astype(cdt), w4_ref[...], preferred_element_type=jnp.float32)
    o_ref[...] = (h + b4_ref[...]).astype(o_ref.dtype)


def _num_tensorcores():
    """TensorCores per chip (2 on v7x, 1 on v5e/v6e). Falls back to 1."""
    try:
        info = pltpu.get_tpu_info()
        for name in ("num_tensorcores", "tensorcore_count", "num_cores",
                     "cores_per_chip", "num_cores_per_chip"):
            v = getattr(info, name, None)
            if v:
                return max(1, int(v))
    except Exception:
        pass
    return 1


def _round_up(n, m):
    return -(-n // m) * m


def prepare_fc_estimator_params(params, compute_dtype=jnp.bfloat16):
    """One-time prep: cast weights to the compute dtype, keep biases f32,
    and zero-pad the last layer to a lane-dense (multiple-of-128) width."""
    cdt = jnp.dtype(compute_dtype)
    output_size = int(params["w4"].shape[1])
    out_pad = max(_LANE, _round_up(output_size, _LANE))
    prepared = {"output_size": output_size, "out_pad": out_pad,
                "compute_dtype": cdt}
    for i in range(1, 5):
        w = params[f"w{i}"].astype(cdt)
        b = params[f"b{i}"].astype(jnp.float32).reshape(1, -1)
        if i == 4 and out_pad != output_size:
            w = jnp.pad(w, ((0, 0), (0, out_pad - output_size)))
            b = jnp.pad(b, ((0, 0), (0, out_pad - output_size)))
        prepared[f"w{i}"] = w
        prepared[f"b{i}"] = b
    return prepared


def fc_estimator_forward(x, prepared, *, batch_tile=2048, min_grid_steps=None):
    """x: (B, input_size) f32.  prepared: output of prepare_fc_estimator_params.

    batch_tile: rows per grid step (sweep 1024-4096).
    min_grid_steps: None -> auto (TensorCore count); set explicitly to override.
    """
    B, input_size = x.shape
    output_size = prepared["output_size"]
    out_pad = prepared["out_pad"]
    cdt = prepared["compute_dtype"]

    # Sublane alignment: bf16 packs 16 rows per vreg group, f32 packs 8.
    align = 16 if cdt.itemsize < 4 else 8
    if min_grid_steps is None:
        min_grid_steps = _num_tensorcores()

    # --- tiling: few, fat grid steps (but keep >=3 when B is large) --------
    Bp = _round_up(B, align)
    tile_cap = max(align, min(_round_up(batch_tile, align), Bp))
    steps = pl.cdiv(Bp, tile_cap)
    if Bp >= 3 * 1024:                 # large batch: keep pipeline overlap
        steps = max(steps, 3)
    steps = max(steps, min_grid_steps)
    if min_grid_steps > 1:             # even split across TensorCores (v7x)
        steps = _round_up(steps, min_grid_steps)
    tile = _round_up(pl.cdiv(Bp, steps), align)
    steps = pl.cdiv(B, tile)           # never schedule fully-OOB tiles

    # --- specs --------------------------------------------------------------
    def rep(p):  # weights/biases: resident, same block every step
        return pl.BlockSpec(p.shape, lambda i: (0, 0))

    if steps > 2:
        # Skinny x rows: 3-deep input pipeline hides the latency-bound DMA.
        x_spec = pl.BlockSpec((tile, input_size), lambda i: (i, 0),
                              pipeline_mode=pl.Buffered(3))
    else:
        x_spec = pl.BlockSpec((tile, input_size), lambda i: (i, 0))

    in_specs = [x_spec,
                rep(prepared["w1"]), rep(prepared["b1"]),
                rep(prepared["w2"]), rep(prepared["b2"]),
                rep(prepared["w3"]), rep(prepared["b3"]),
                rep(prepared["w4"]), rep(prepared["b4"])]
    out_spec = pl.BlockSpec((tile, out_pad), lambda i: (i, 0))

    # --- cost hint for the XLA scheduler ------------------------------------
    weight_bytes = sum(int(prepared[f"w{i}"].size) * cdt.itemsize
                       for i in range(1, 5)) + \
                   sum(int(prepared[f"b{i}"].size) * 4 for i in range(1, 5))
    cost = pl.CostEstimate(
        flops=2 * B * (input_size * _H1 + _H1 * _H2 + _H2 * _H3
                       + _H3 * out_pad),
        transcendentals=0,
        bytes_accessed=B * input_size * 4 + B * out_pad * 4 + weight_bytes,
    )

    out = pl.pallas_call(
        _mlp_kernel,
        out_shape=jax.ShapeDtypeStruct((B, out_pad), jnp.float32),
        grid_spec=pltpu.PrefetchScalarGridSpec(
            num_scalar_prefetch=0,
            grid=(steps,),
            in_specs=in_specs,
            out_specs=out_spec,
        ),
        compiler_params=pltpu.CompilerParams(
            dimension_semantics=("parallel",),
            vmem_limit_bytes=32 * 1024 * 1024,  # safe on v7x's 64 MiB VMEM
        ),
        cost_estimate=cost,
    )(x, prepared["w1"], prepared["b1"], prepared["w2"], prepared["b2"],
      prepared["w3"], prepared["b3"], prepared["w4"], prepared["b4"])

    return out[:, :output_size] if out_pad != output_size else out


def init_fc_estimator_params(key, input_size, output_size):
    """Deterministic synthetic init matching nn.Linear shapes.

    PyTorch nn.Linear(in, out) has weight (out, in) and computes x @ W.T + b.
    We store the transposed weight (in, out) directly (f32 masters).
    """
    dims = [(input_size, _H1), (_H1, _H2), (_H2, _H3), (_H3, output_size)]
    params = {}
    for idx, (fan_in, fan_out) in enumerate(dims, start=1):
        key, kw, kb = jax.random.split(key, 3)
        bound = 1.0 / jnp.sqrt(fan_in)  # PyTorch default U(-1/sqrt(fan_in), +)
        params[f"w{idx}"] = jax.random.uniform(
            kw, (fan_in, fan_out), jnp.float32, -bound, bound)
        params[f"b{idx}"] = jax.random.uniform(
            kb, (1, fan_out), jnp.float32, -bound, bound)
    return params


def fc_estimator_ref(x, params):
    """Pure-JAX f32 reference of the PyTorch forward for validation."""
    h = jax.nn.relu(x @ params["w1"] + params["b1"])
    h = jax.nn.relu(h @ params["w2"] + params["b2"])
    h = jax.nn.relu(h @ params["w3"] + params["b3"])
    return h @ params["w4"] + params["b4"]


if __name__ == "__main__":
    key = jax.random.PRNGKey(0)
    k_params, k_x = jax.random.split(key)

    input_size = 16
    output_size = 8
    params = init_fc_estimator_params(k_params, input_size, output_size)

    # Cast / lane-pad the weights ONCE; reused by every forward call.
    prep_bf16 = prepare_fc_estimator_params(params, jnp.bfloat16)
    prep_f32 = prepare_fc_estimator_params(params, jnp.float32)

    # --- Check 1: single fat grid step (grid=(1,)), f32 operands.
    B1 = 512
    x1 = jax.random.normal(k_x, (B1, input_size), jnp.float32)
    out1 = jax.block_until_ready(fc_estimator_forward(x1, prep_f32))
    ref1 = fc_estimator_ref(x1, params)
    assert out1.shape == (B1, output_size)
    assert jnp.allclose(out1, ref1, atol=1e-2, rtol=1e-2), "f32 mismatch (1)"

    # --- Check 2: ragged batch (masked last tile) + forced 2-way core split
    #     (v7x path) + bf16 operands.
    B2 = 500
    x2 = x1[:B2]
    out2 = jax.block_until_ready(
        fc_estimator_forward(x2, prep_bf16, min_grid_steps=2))
    ref2 = fc_estimator_ref(x2, params)
    assert out2.shape == (B2, output_size)
    assert jnp.allclose(out2, ref2, atol=5e-2, rtol=5e-2), "bf16 mismatch (2)"

    # --- Check 3: multi-step grid (4 tiles of 256) exercising Buffered(3).
    B3 = 1024
    x3 = jax.random.normal(jax.random.PRNGKey(1), (B3, input_size), jnp.float32)
    out3 = jax.block_until_ready(
        fc_estimator_forward(x3, prep_bf16, batch_tile=256))
    ref3 = fc_estimator_ref(x3, params)
    assert out3.shape == (B3, output_size)
    assert jnp.allclose(out3, ref3, atol=5e-2, rtol=5e-2), "bf16 mismatch (3)"

    print("KERNEL_OK")
</pallas_src>

<mosaic_0001>
module attributes {stable_mosaic.version = 11 : i64} {
  func.func @_mlp_kernel(%arg0: i32, %arg1: memref<512x16xf32, #tpu.memory_space<vmem>>, %arg2: memref<16x128xf32, #tpu.memory_space<vmem>>, %arg3: memref<1x128xf32, #tpu.memory_space<vmem>>, %arg4: memref<128x64xf32, #tpu.memory_space<vmem>>, %arg5: memref<1x64xf32, #tpu.memory_space<vmem>>, %arg6: memref<64x32xf32, #tpu.memory_space<vmem>>, %arg7: memref<1x32xf32, #tpu.memory_space<vmem>>, %arg8: memref<32x128xf32, #tpu.memory_space<vmem>>, %arg9: memref<1x128xf32, #tpu.memory_space<vmem>>, %arg10: memref<512x128xf32, #tpu.memory_space<vmem>>) attributes {dimension_semantics = [#tpu.dimension_semantics<parallel>], iteration_bounds = array<i64: 1>, scalar_prefetch = 0 : i64, scratch_operands = 0 : i64, tpu.core_type = #tpu.core_type<tc>, window_params = [{transform_indices = @transform_0, window_bounds = array<i64: 512, 16>}, {pipeline_mode = #tpu.pipeline_mode<synchronous>, transform_indices = @transform_1, window_bounds = array<i64: 16, 128>}, {pipeline_mode = #tpu.pipeline_mode<synchronous>, transform_indices = @transform_2, window_bounds = array<i64: 1, 128>}, {pipeline_mode = #tpu.pipeline_mode<synchronous>, transform_indices = @transform_3, window_bounds = array<i64: 128, 64>}, {pipeline_mode = #tpu.pipeline_mode<synchronous>, transform_indices = @transform_4, window_bounds = array<i64: 1, 64>}, {pipeline_mode = #tpu.pipeline_mode<synchronous>, transform_indices = @transform_5, window_bounds = array<i64: 64, 32>}, {pipeline_mode = #tpu.pipeline_mode<synchronous>, transform_indices = @transform_6, window_bounds = array<i64: 1, 32>}, {pipeline_mode = #tpu.pipeline_mode<synchronous>, transform_indices = @transform_7, window_bounds = array<i64: 32, 128>}, {pipeline_mode = #tpu.pipeline_mode<synchronous>, transform_indices = @transform_8, window_bounds = array<i64: 1, 128>}, {transform_indices = @transform_9, window_bounds = array<i64: 512, 128>}]} {
    %c0 = arith.constant 0 : index
    %c0_0 = arith.constant 0 : index
    %0 = vector.load %arg1[%c0, %c0_0] : memref<512x16xf32, #tpu.memory_space<vmem>>, vector<512x16xf32>
    %c0_1 = arith.constant 0 : index
    %c0_2 = arith.constant 0 : index
    %1 = vector.load %arg2[%c0_1, %c0_2] : memref<16x128xf32, #tpu.memory_space<vmem>>, vector<16x128xf32>
    %cst = arith.constant dense<0.000000e+00> : vector<512x128xf32>
    %2 = tpu.matmul %0, %1, %cst {dimension_numbers = #tpu.dot_dimension_numbers<[1], [0], [0], [1], [0, 0, 1, 1], [], []>} : vector<512x16xf32>, vector<16x128xf32>, vector<512x128xf32> -> vector<512x128xf32>
    %c0_3 = arith.constant 0 : index
    %c0_4 = arith.constant 0 : index
    %3 = vector.load %arg3[%c0_3, %c0_4] : memref<1x128xf32, #tpu.memory_space<vmem>>, vector<1x128xf32>
    %4 = vector.broadcast %3 : vector<1x128xf32> to vector<512x128xf32>
    %5 = arith.addf %2, %4 : vector<512x128xf32>
    %cst_5 = arith.constant 0.000000e+00 : f32
    %6 = vector.broadcast %cst_5 : f32 to vector<512x128xf32>
    %7 = arith.maximumf %5, %6 : vector<512x128xf32>
    %c0_6 = arith.constant 0 : index
    %c0_7 = arith.constant 0 : index
    %8 = vector.load %arg4[%c0_6, %c0_7] : memref<128x64xf32, #tpu.memory_space<vmem>>, vector<128x64xf32>
    %cst_8 = arith.constant dense<0.000000e+00> : vector<512x64xf32>
    %9 = tpu.matmul %7, %8, %cst_8 {dimension_numbers = #tpu.dot_dimension_numbers<[1], [0], [0], [1], [0, 0, 1, 1], [], []>} : vector<512x128xf32>, vector<128x64xf32>, vector<512x64xf32> -> vector<512x64xf32>
    %c0_9 = arith.constant 0 : index
    %c0_10 = arith.constant 0 : index
    %10 = vector.load %arg5[%c0_9, %c0_10] : memref<1x64xf32, #tpu.memory_space<vmem>>, vector<1x64xf32>
    %11 = vector.broadcast %10 : vector<1x64xf32> to vector<512x64xf32>
    %12 = arith.addf %9, %11 : vector<512x64xf32>
    %cst_11 = arith.constant 0.000000e+00 : f32
    %13 = vector.broadcast %cst_11 : f32 to vector<512x64xf32>
    %14 = arith.maximumf %12, %13 : vector<512x64xf32>
    %c0_12 = arith.constant 0 : index
    %c0_13 = arith.constant 0 : index
    %15 = vector.load %arg6[%c0_12, %c0_13] : memref<64x32xf32, #tpu.memory_space<vmem>>, vector<64x32xf32>
    %cst_14 = arith.constant dense<0.000000e+00> : vector<512x32xf32>
    %16 = tpu.matmul %14, %15, %cst_14 {dimension_numbers = #tpu.dot_dimension_numbers<[1], [0], [0], [1], [0, 0, 1, 1], [], []>} : vector<512x64xf32>, vector<64x32xf32>, vector<512x32xf32> -> vector<512x32xf32>
    %c0_15 = arith.constant 0 : index
    %c0_16 = arith.constant 0 : index
    %17 = vector.load %arg7[%c0_15, %c0_16] : memref<1x32xf32, #tpu.memory_space<vmem>>, vector<1x32xf32>
    %18 = vector.broadcast %17 : vector<1x32xf32> to vector<512x32xf32>
    %19 = arith.addf %16, %18 : vector<512x32xf32>
    %cst_17 = arith.constant 0.000000e+00 : f32
    %20 = vector.broadcast %cst_17 : f32 to vector<512x32xf32>
    %21 = arith.maximumf %19, %20 : vector<512x32xf32>
    %c0_18 = arith.constant 0 : index
    %c0_19 = arith.constant 0 : index
    %22 = vector.load %arg8[%c0_18, %c0_19] : memref<32x128xf32, #tpu.memory_space<vmem>>, vector<32x128xf32>
    %cst_20 = arith.constant dense<0.000000e+00> : vector<512x128xf32>
    %23 = tpu.matmul %21, %22, %cst_20 {dimension_numbers = #tpu.dot_dimension_numbers<[1], [0], [0], [1], [0, 0, 1, 1], [], []>} : vector<512x32xf32>, vector<32x128xf32>, vector<512x128xf32> -> vector<512x128xf32>
    %c0_21 = arith.constant 0 : index
    %c0_22 = arith.constant 0 : index
    %24 = vector.load %arg9[%c0_21, %c0_22] : memref<1x128xf32, #tpu.memory_space<vmem>>, vector<1x128xf32>
    %25 = vector.broadcast %24 : vector<1x128xf32> to vector<512x128xf32>
    %26 = arith.addf %23, %25 : vector<512x128xf32>
    %c0_23 = arith.constant 0 : index
    %c0_24 = arith.constant 0 : index
    %27 = vector.load %arg10[%c0_23, %c0_24] : memref<512x128xf32, #tpu.memory_space<vmem>>, vector<512x128xf32>
    tpu.vector_store %arg10[%c0_23, %c0_24], %26 {strides = array<i32>} : memref<512x128xf32, #tpu.memory_space<vmem>>, vector<512x128xf32>,
    return
  }
  func.func @transform_0(%arg0: i32) -> (i32, i32) {
    %c0_i32 = arith.constant 0 : i32
    %c0_i32_0 = arith.constant 0 : i32
    return %arg0, %c0_i32 : i32, i32
  }
  func.func @transform_1(%arg0: i32) -> (i32, i32) {
    %c0_i32 = arith.constant 0 : i32
    %c0_i32_0 = arith.constant 0 : i32
    %c0_i32_1 = arith.constant 0 : i32
    return %c0_i32, %c0_i32_0 : i32, i32
  }
  func.func @transform_2(%arg0: i32) -> (i32, i32) {
    %c0_i32 = arith.constant 0 : i32
    %c0_i32_0 = arith.constant 0 : i32
    %c0_i32_1 = arith.constant 0 : i32
    return %c0_i32, %c0_i32_0 : i32, i32
  }
  func.func @transform_3(%arg0: i32) -> (i32, i32) {
    %c0_i32 = arith.constant 0 : i32
    %c0_i32_0 = arith.constant 0 : i32
    %c0_i32_1 = arith.constant 0 : i32
    return %c0_i32, %c0_i32_0 : i32, i32
  }
  func.func @transform_4(%arg0: i32) -> (i32, i32) {
    %c0_i32 = arith.constant 0 : i32
    %c0_i32_0 = arith.constant 0 : i32
    %c0_i32_1 = arith.constant 0 : i32
    return %c0_i32, %c0_i32_0 : i32, i32
  }
  func.func @transform_5(%arg0: i32) -> (i32, i32) {
    %c0_i32 = arith.constant 0 : i32
    %c0_i32_0 = arith.constant 0 : i32
    %c0_i32_1 = arith.constant 0 : i32
    return %c0_i32, %c0_i32_0 : i32, i32
  }
  func.func @transform_6(%arg0: i32) -> (i32, i32) {
    %c0_i32 = arith.constant 0 : i32
    %c0_i32_0 = arith.constant 0 : i32
    %c0_i32_1 = arith.constant 0 : i32
    return %c0_i32, %c0_i32_0 : i32, i32
  }
  func.func @transform_7(%arg0: i32) -> (i32, i32) {
    %c0_i32 = arith.constant 0 : i32
    %c0_i32_0 = arith.constant 0 : i32
    %c0_i32_1 = arith.constant 0 : i32
    return %c0_i32, %c0_i32_0 : i32, i32
  }
  func.func @transform_8(%arg0: i32) -> (i32, i32) {
    %c0_i32 = arith.constant 0 : i32
    %c0_i32_0 = arith.constant 0 : i32
    %c0_i32_1 = arith.constant 0 : i32
    return %c0_i32, %c0_i32_0 : i32, i32
  }
  func.func @transform_9(%arg0: i32) -> (i32, i32) {
    %c0_i32 = arith.constant 0 : i32
    %c0_i32_0 = arith.constant 0 : i32
    return %arg0, %c0_i32 : i32, i32
  }
}

</mosaic_0001>

<bundles_post_ra>
// kernel: tpu_custom_call.1
= control target key start
LH: loop header
LB: loop body
LE: loop exit
PB: predicated region body
PF: predicated region fallthrough
CT: control target
= control target key end

     0   :  { %vm106_vm0 = vcmask 130048   ;;  %s4311_s0 = inlined_call_operand.vmem [shape: f32[512,16], index: 0, kind: input, shape index: {}]   ;;  %s4312_s1 = inlined_call_operand.vmem [shape: f32[16,128], index: 1, kind: input, shape index: {}]   ;;  %s4313_s2 = inlined_call_operand.vmem [shape: f32[1,128], index: 2, kind: input, shape index: {}]   ;;  %s4314_s3 = inlined_call_operand.vmem [shape: f32[128,64], index: 3, kind: input, shape index: {}]   ;;  %s4315_s4 = inlined_call_operand.vmem [shape: f32[1,64], index: 4, kind: input, shape index: {}]   ;;  %s4316_s5 = inlined_call_operand.vmem [shape: f32[64,32], index: 5, kind: input, shape index: {}]   ;;  %s4317_s6 = inlined_call_operand.vmem [shape: f32[1,32], index: 6, kind: input, shape index: {}]   ;;  %s4318_s7 = inlined_call_operand.vmem [shape: f32[32,128], index: 7, kind: input, shape index: {}]   ;;  %s4319_s8 = inlined_call_operand.vmem [shape: f32[1,128], index: 8, kind: input, shape index: {}]   ;;  %s4320_s9 = inlined_call_operand.hbm [shape: f32[512,128], index: 9, kind: output, shape index: {}]  }
   0x1   :  { %v98_v0 = vld [vmem:[%s4312_s1 + $0x8] sm:$0xff]  ;;  %v97_v1 = vld [vmem:[%s4312_s1] sm:$0xff]  ;;  %v35_v4 = vld [vmem:[%s4311_s0 + $0x10] sm:$0xff] }
   0x2   :  { %v33_v2 = vld [vmem:[%s4311_s0] sm:$0xff]  ;;  %3028 = vmatprep.subr.mxu0 %v98_v0  ;;  %v34_v3 = vld [vmem:[%s4311_s0 + $0x8] sm:$0xff]  ;;  %v36_v5 = vld [vmem:[%s4311_s0 + $0x18] sm:$0xff] }
   0x3   :  { %3032 = vmatprep.mubr.msk.f32.mxu0 %vm106_vm0, %v33_v2  ;;  %3029 = vmatpush3.msra.mxu0 %v98_v0  ;;  %v37_v6 = vld [vmem:[%s4311_s0 + $0x20] sm:$0xff]  ;;  %v38_v7 = vld [vmem:[%s4311_s0 + $0x28] sm:$0xff]  ;;  %v39_v8 = vld [vmem:[%s4311_s0 + $0x30] sm:$0xff] }
   0x4   :  { %3030 = vmatprep.subr.mxu0 %v97_v1  ;;  %v40_v9 = vld [vmem:[%s4311_s0 + $0x38] sm:$0xff]  ;;  %v41_v10 = vld [vmem:[%s4311_s0 + $0x40] sm:$0xff]  ;;  %v42_v11 = vld [vmem:[%s4311_s0 + $0x48] sm:$0xff] }
   0x5   :  { %3031 = vmatpush3.msra.mxu0 %v97_v1  ;;  %v43_v12 = vld [vmem:[%s4311_s0 + $0x50] sm:$0xff]  ;;  %v44_v13 = vld [vmem:[%s4311_s0 + $0x58] sm:$0xff]  ;;  %v45_v16 = vld [vmem:[%s4311_s0 + $0x60] sm:$0xff] }
   0x6   :  { %3033 = vmatmul.mubr.msk.f32.vlgmr.msra.gmra.mxu0 %vm106_vm0, %v34_v3  ;;  %v763_v14 = vld [vmem:[%s4314_s3 + $0x78] sm:$0xff]  ;;  %v762_v15 = vld [vmem:[%s4314_s3 + $0x70] sm:$0xff]  ;;  %v761_v17 = vld [vmem:[%s4314_s3 + $0x68] sm:$0xff] }
   0x7   :  { %3035 = vmatprep.mubr.msk.f32.mxu0 %vm106_vm0, %v35_v4  ;;  %3128 = vmatprep.subr.mxu1 %v763_v14  ;;  %v46_v18 = vld [vmem:[%s4311_s0 + $0x68] sm:$0xff]  ;;  %v760_v19 = vld [vmem:[%s4314_s3 + $0x60] sm:$0xff] }
   0x8   :  { %3129 = vmatpush3.msra.mxu1 %v763_v14 }
   0x9   :  { %3130 = vmatprep.subr.mxu1 %v762_v15 }
   0xa   :  { %3036 = vmatmul.mubr.msk.f32.gmra.mxu0 %vm106_vm0, %v36_v5  ;;  %3131 = vmatpush3.msra.mxu1 %v762_v15 }
   0xb   :  { %3038 = vmatprep.mubr.msk.f32.mxu0 %vm106_vm0, %v37_v6 }
   0xe   :  { %3039 = vmatmul.mubr.msk.f32.gmra.mxu0 %vm106_vm0, %v38_v7 }
   0xf   :  { %3041 = vmatprep.mubr.msk.f32.mxu0 %vm106_vm0, %v39_v8 }
  0x12   :  { %3042 = vmatmul.mubr.msk.f32.gmra.mxu0 %vm106_vm0, %v40_v9 }
  0x13   :  { %3044 = vmatprep.mubr.msk.f32.mxu0 %vm106_vm0, %v41_v10 }
  0x16   :  { %3045 = vmatmul.mubr.msk.f32.gmra.mxu0 %vm106_vm0, %v42_v11 }
  0x17   :  { %3047 = vmatprep.mubr.msk.f32.mxu0 %vm106_vm0, %v43_v12 }
  0x1a   :  { %3048 = vmatmul.mubr.msk.f32.gmra.mxu0 %vm106_vm0, %v44_v13 }
  0x1b   :  { %3050 = vmatprep.mubr.msk.f32.mxu0 %vm106_vm0, %v45_v16 }
  0x1c   :  { %14 = vsyncpa [#allocation3], 0  ;;  %v47_v20 = vld [vmem:[%s4311_s0 + $0x70] sm:$0xff]  ;;  %3132 = vmatprep.subr.mxu1 %v761_v17  ;;  %v759_v21 = vld [vmem:[%s4314_s3 + $0x58] sm:$0xff]  ;;  %vm1235_vm1 = vcmask 523264   ;;  %vm1888_vm2 = vcmask 261120  }
  0x1d   :  { %3133 = vmatpush3.msra.mxu1 %v761_v17  ;;  %v48_v22 = vld [vmem:[%s4311_s0 + $0x78] sm:$0xff]  ;;  %v758_v23 = vld [vmem:[%s4314_s3 + $0x50] sm:$0xff]  ;;  %v49_v24 = vld [vmem:[%s4311_s0 + $0x80] sm:$0xff] }
  0x1e   :  { %3051 = vmatmul.mubr.msk.f32.gmra.mxu0 %vm106_vm0, %v46_v18  ;;  %3134 = vmatprep.subr.mxu1 %v760_v19  ;;  %v757_v25 = vld [vmem:[%s4314_s3 + $0x48] sm:$0xff]  ;;  %v756_v27 = vld [vmem:[%s4314_s3 + $0x40] sm:$0xff]  ;;  %v51_v28 = vld [vmem:[%s4311_s0 + $0x90] sm:$0xff] }
  0x1f   :  { %3053 = vmatprep.mubr.msk.f32.mxu0 %vm106_vm0, %v47_v20  ;;  %3135 = vmatpush3.msra.mxu1 %v760_v19  ;;  %v50_v26 = vld [vmem:[%s4311_s0 + $0x88] sm:$0xff]  ;;  %v755_v29 = vld [vmem:[%s4314_s3 + $0x38] sm:$0xff]  ;;  %v754_v31 = vld [vmem:[%s4314_s3 + $0x30] sm:$0xff] }
  0x20   :  { %3136 = vmatprep.subr.mxu1 %v759_v21  ;;  %v52_v30 = vld [vmem:[%s4311_s0 + $0x98] sm:$0xff]  ;;  %v53_v32 = vld [vmem:[%s4311_s0 + $0xa0] sm:$0xff]  ;;  %v753_v33 = vld [vmem:[%s4314_s3 + $0x28] sm:$0xff] }
  0x21   :  { %3137 = vmatpush3.msra.mxu1 %v759_v21  ;;  %v54_v34 = vld [vmem:[%s4311_s0 + $0xa8] sm:$0xff]  ;;  %v752_v35 = vld [vmem:[%s4314_s3 + $0x20] sm:$0xff]  ;;  %v55_v36 = vld [vmem:[%s4311_s0 + $0xb0] sm:$0xff] }
  0x22   :  { %3054 = vmatmul.mubr.msk.f32.gmra.mxu0 %vm106_vm0, %v48_v22  ;;  %3138 = vmatprep.subr.mxu1 %v758_v23  ;;  %v56_v37 = vld [vmem:[%s4311_s0 + $0xb8] sm:$0xff]  ;;  %v57_v38 = vld [vmem:[%s4311_s0 + $0xc0] sm:$0xff]  ;;  %v58_v39 = vld [vmem:[%s4311_s0 + $0xc8] sm:$0xff] }
  0x23   :  { %3056 = vmatprep.mubr.msk.f32.mxu0 %vm106_vm0, %v49_v24  ;;  %3139 = vmatpush3.msra.mxu1 %v758_v23  ;;  %v59_v40 = vld [vmem:[%s4311_s0 + $0xd0] sm:$0xff]  ;;  %v60_v41 = vld [vmem:[%s4311_s0 + $0xd8] sm:$0xff]  ;;  %v61_v42 = vld [vmem:[%s4311_s0 + $0xe0] sm:$0xff] }
  0x24   :  { %3140 = vmatprep.subr.mxu1 %v757_v25  ;;  %v62_v43 = vld [vmem:[%s4311_s0 + $0xe8] sm:$0xff]  ;;  %v63_v44 = vld [vmem:[%s4311_s0 + $0xf0] sm:$0xff]  ;;  %v64_v45 = vld [vmem:[%s4311_s0 + $0xf8] sm:$0xff] }
  0x25   :  { %3141 = vmatpush3.msra.mxu1 %v757_v25  ;;  %v65_v46 = vld [vmem:[%s4311_s0 + $0x100] sm:$0xff]  ;;  %v66_v47 = vld [vmem:[%s4311_s0 + $0x108] sm:$0xff]  ;;  %v67_v48 = vld [vmem:[%s4311_s0 + $0x110] sm:$0xff] }
  0x26   :  { %3057 = vmatmul.mubr.msk.f32.gmra.mxu0 %vm106_vm0, %v50_v26  ;;  %3142 = vmatprep.subr.mxu1 %v756_v27  ;;  %v751_v49 = vld [vmem:[%s4314_s3 + $0x18] sm:$0xff]  ;;  %v750_v51 = vld [vmem:[%s4314_s3 + $0x10] sm:$0xff]  ;;  %v69_v52 = vld [vmem:[%s4311_s0 + $0x120] sm:$0xff] }
  0x27   :  { %3059 = vmatprep.mubr.msk.f32.mxu0 %vm106_vm0, %v51_v28  ;;  %3143 = vmatpush3.msra.mxu1 %v756_v27  ;;  %v68_v50 = vld [vmem:[%s4311_s0 + $0x118] sm:$0xff]  ;;  %v749_v53 = vld [vmem:[%s4314_s3 + $0x8] sm:$0xff]  ;;  %v748_v55 = vld [vmem:[%s4314_s3] sm:$0xff] }
  0x28   :  { %3144 = vmatprep.subr.mxu1 %v755_v29  ;;  %v70_v54 = vld [vmem:[%s4311_s0 + $0x128] sm:$0xff]  ;;  %v71_v56 = vld [vmem:[%s4311_s0 + $0x130] sm:$0xff]  ;;  %v72_v57 = vld [vmem:[%s4311_s0 + $0x138] sm:$0xff] }
  0x29   :  { %3145 = vmatpush3.msra.mxu1 %v755_v29  ;;  %v73_v58 = vld [vmem:[%s4311_s0 + $0x140] sm:$0xff]  ;;  %v74_v59 = vld [vmem:[%s4311_s0 + $0x148] sm:$0xff]  ;;  %v75_v60 = vld [vmem:[%s4311_s0 + $0x150] sm:$0xff] }
  0x2a   :  { %3060 = vmatmul.mubr.msk.f32.gmra.mxu0 %vm106_vm0, %v52_v30  ;;  %3146 = vmatprep.subr.mxu1 %v754_v31  ;;  %v76_v61 = vld [vmem:[%s4311_s0 + $0x158] sm:$0xff]  ;;  %v77_v62 = vld [vmem:[%s4311_s0 + $0x160] sm:$0xff]  ;;  %v78_v63 = vld [vmem:[%s4311_s0 + $0x168] sm:$0xff] }
  0x2b   :  { %3062 = vmatprep.mubr.msk.f32.mxu0 %vm106_vm0, %v53_v32  ;;  %3147 = vmatpush3.msra.mxu1 %v754_v31  ;;  %v79_v0 = vld [vmem:[%s4311_s0 + $0x170] sm:$0xff]  ;;  %v80_v1 = vld [vmem:[%s4311_s0 + $0x178] sm:$0xff]  ;;  %v81_v2 = vld [vmem:[%s4311_s0 + $0x180] sm:$0xff] }
  0x2c   :  { %3148 = vmatprep.subr.mxu1 %v753_v33  ;;  %v82_v3 = vld [vmem:[%s4311_s0 + $0x188] sm:$0xff]  ;;  %v83_v4 = vld [vmem:[%s4311_s0 + $0x190] sm:$0xff]  ;;  %v84_v5 = vld [vmem:[%s4311_s0 + $0x198] sm:$0xff] }
  0x2d   :  { %3149 = vmatpush3.msra.mxu1 %v753_v33  ;;  %v85_v6 = vld [vmem:[%s4311_s0 + $0x1a0] sm:$0xff]  ;;  %v86_v7 = vld [vmem:[%s4311_s0 + $0x1a8] sm:$0xff]  ;;  %v87_v8 = vld [vmem:[%s4311_s0 + $0x1b0] sm:$0xff] }
  0x2e   :  { %3063 = vmatmul.mubr.msk.f32.gmra.mxu0 %vm106_vm0, %v54_v34  ;;  %3150 = vmatprep.subr.mxu1 %v752_v35  ;;  %v88_v9 = vld [vmem:[%s4311_s0 + $0x1b8] sm:$0xff]  ;;  %v89_v10 = vld [vmem:[%s4311_s0 + $0x1c0] sm:$0xff]  ;;  %v90_v11 = vld [vmem:[%s4311_s0 + $0x1c8] sm:$0xff] }
  0x2f   :  { %3065 = vmatprep.mubr.msk.f32.mxu0 %vm106_vm0, %v55_v36  ;;  %3151 = vmatpush3.msra.mxu1 %v752_v35  ;;  %v91_v12 = vld [vmem:[%s4311_s0 + $0x1d0] sm:$0xff]  ;;  %v92_v13 = vld [vmem:[%s4311_s0 + $0x1d8] sm:$0xff]  ;;  %v93_v14 = vld [vmem:[%s4311_s0 + $0x1e0] sm:$0xff] }
  0x30   :  { %3152 = vmatprep.subr.mxu1 %v751_v49  ;;  %v94_v15 = vld [vmem:[%s4311_s0 + $0x1e8] sm:$0xff]  ;;  %v95_v16 = vld [vmem:[%s4311_s0 + $0x1f0] sm:$0xff]  ;;  %v96_v17 = vld [vmem:[%s4311_s0 + $0x1f8] sm:$0xff] }
  0x31   :  { %3153 = vmatpush3.msra.mxu1 %v751_v49  ;;  %v1227_v18 = vld [vmem:[%s4316_s5 + $0x38] sm:$0xff]  ;;  %v1226_v19 = vld [vmem:[%s4316_s5 + $0x30] sm:$0xff]  ;;  %v1225_v20 = vld [vmem:[%s4316_s5 + $0x28] sm:$0xff] }
  0x32   :  { %3066 = vmatmul.mubr.msk.f32.gmra.mxu0 %vm106_vm0, %v56_v37  ;;  %3154 = vmatprep.subr.mxu1 %v750_v51  ;;  %v3880_v21 = vld [vmem:[%s4313_s2] ss:$0 sm:$0xff]  ;;  %v1223_v28 = vld [vmem:[%s4316_s5 + $0x18] sm:$0xff]  ;;  %v1222_v29 = vld [vmem:[%s4316_s5 + $0x10] sm:$0xff] }
  0x33   :  { %3068 = vmatprep.mubr.msk.f32.mxu0 %vm106_vm0, %v57_v38  ;;  %3155 = vmatpush3.msra.mxu1 %v750_v51  ;;  %v1224_v23 = vld [vmem:[%s4316_s5 + $0x20] sm:$0xff]  ;;  %v1221_v34 = vld [vmem:[%s4316_s5 + $0x8] sm:$0xff] }
  0x34   :  { %3156 = vmatprep.subr.mxu1 %v749_v53  ;;  %3256 = vmatprep.subr.mxu0 %v1227_v18  ;;  %v1220_v37 = vld [vmem:[%s4316_s5] sm:$0xff] }
  0x35   :  { %3157 = vmatpush3.msra.mxu1 %v749_v53  ;;  %3257 = vmatpush3.msra.mxu0 %v1227_v18 }
  0x36   :  { %3069 = vmatmul.mubr.msk.f32.gmra.mxu0 %vm106_vm0, %v58_v39  ;;  %3158 = vmatprep.subr.mxu1 %v748_v55 }
  0x37   :  { %3071 = vmatprep.mubr.msk.f32.mxu0 %vm106_vm0, %v59_v40  ;;  %3159 = vmatpush3.msra.mxu1 %v748_v55 }
  0x38   :  { %3258 = vmatprep.subr.mxu0 %v1226_v19 }
  0x39   :  { %3259 = vmatpush3.msra.mxu0 %v1226_v19 }
  0x3a   :  { %3072 = vmatmul.mubr.msk.f32.gmra.mxu0 %vm106_vm0, %v60_v41  ;;  %3260 = vmatprep.subr.mxu0 %v1225_v20 }
  0x3b   :  { %3074 = vmatprep.mubr.msk.f32.mxu0 %vm106_vm0, %v61_v42  ;;  %3261 = vmatpush3.msra.mxu0 %v1225_v20 }
  0x3c   :  { %3262 = vmatprep.subr.mxu0 %v1224_v23 }
  0x3d   :  { %3263 = vmatpush3.msra.mxu0 %v1224_v23 }
  0x3e   :  { %3075 = vmatmul.mubr.msk.f32.gmra.mxu0 %vm106_vm0, %v62_v43  ;;  %3264 = vmatprep.subr.mxu0 %v1223_v28 }
  0x3f   :  { %3077 = vmatprep.mubr.msk.f32.mxu0 %vm106_vm0, %v63_v44  ;;  %3265 = vmatpush3.msra.mxu0 %v1223_v28 }
  0x40   :  { %3266 = vmatprep.subr.mxu0 %v1222_v29 }
  0x41   :  { %3267 = vmatpush3.msra.mxu0 %v1222_v29 }
  0x42   :  { %3078 = vmatmul.mubr.msk.f32.gmra.mxu0 %vm106_vm0, %v64_v45  ;;  %3268 = vmatprep.subr.mxu0 %v1221_v34 }
  0x43   :  { %3080 = vmatprep.mubr.msk.f32.mxu0 %vm106_vm0, %v65_v46  ;;  %3269 = vmatpush3.msra.mxu0 %v1221_v34 }
  0x44   :  { %3270 = vmatprep.subr.mxu0 %v1220_v37 }
  0x45   :  { %3271 = vmatpush3.msra.mxu0 %v1220_v37 }
  0x46   :  { %3081 = vmatmul.mubr.msk.f32.gmra.mxu0 %vm106_vm0, %v66_v47 }
  0x47   :  { %3083 = vmatprep.mubr.msk.f32.mxu0 %vm106_vm0, %v67_v48 }
  0x4a   :  { %3084 = vmatmul.mubr.msk.f32.gmra.mxu0 %vm106_vm0, %v68_v50 }
  0x4b   :  { %3086 = vmatprep.mubr.msk.f32.mxu0 %vm106_vm0, %v69_v52 }
  0x4e   :  { %3087 = vmatmul.mubr.msk.f32.gmra.mxu0 %vm106_vm0, %v70_v54 }
  0x4f   :  { %3089 = vmatprep.mubr.msk.f32.mxu0 %vm106_vm0, %v71_v56 }
  0x52   :  { %3090 = vmatmul.mubr.msk.f32.gmra.mxu0 %vm106_vm0, %v72_v57 }
  0x53   :  { %3092 = vmatprep.mubr.msk.f32.mxu0 %vm106_vm0, %v73_v58 }
  0x56   :  { %3093 = vmatmul.mubr.msk.f32.gmra.mxu0 %vm106_vm0, %v74_v59 }
  0x57   :  { %3095 = vmatprep.mubr.msk.f32.mxu0 %vm106_vm0, %v75_v60 }
  0x5a   :  { %3096 = vmatmul.mubr.msk.f32.gmra.mxu0 %vm106_vm0, %v76_v61 }
  0x5b   :  { %3098 = vmatprep.mubr.msk.f32.mxu0 %vm106_vm0, %v77_v62 }
  0x5e   :  { %3099 = vmatmul.mubr.msk.f32.gmra.mxu0 %vm106_vm0, %v78_v63 }
  0x5f   :  { %3101 = vmatprep.mubr.msk.f32.mxu0 %vm106_vm0, %v79_v0 }
  0x62   :  { %3102 = vmatmul.mubr.msk.f32.gmra.mxu0 %vm106_vm0, %v80_v1 }
  0x63   :  { %3104 = vmatprep.mubr.msk.f32.mxu0 %vm106_vm0, %v81_v2 }
  0x66   :  { %3105 = vmatmul.mubr.msk.f32.gmra.mxu0 %vm106_vm0, %v82_v3 }
  0x67   :  { %3107 = vmatprep.mubr.msk.f32.mxu0 %vm106_vm0, %v83_v4 }
  0x6a   :  { %3108 = vmatmul.mubr.msk.f32.gmra.mxu0 %vm106_vm0, %v84_v5 }
  0x6b   :  { %3110 = vmatprep.mubr.msk.f32.mxu0 %vm106_vm0, %v85_v6 }
  0x6e   :  { %3111 = vmatmul.mubr.msk.f32.gmra.mxu0 %vm106_vm0, %v86_v7 }
  0x6f   :  { %3113 = vmatprep.mubr.msk.f32.mxu0 %vm106_vm0, %v87_v8 }
  0x72   :  { %3114 = vmatmul.mubr.msk.f32.gmra.mxu0 %vm106_vm0, %v88_v9 }
  0x73   :  { %3116 = vmatprep.mubr.msk.f32.mxu0 %vm106_vm0, %v89_v10 }
  0x76   :  { %3117 = vmatmul.mubr.msk.f32.gmra.mxu0 %vm106_vm0, %v90_v11 }
  0x77   :  { %3119 = vmatprep.mubr.msk.f32.mxu0 %vm106_vm0, %v91_v12 }
  0x7a   :  { %3120 = vmatmul.mubr.msk.f32.gmra.mxu0 %vm106_vm0, %v92_v13 }
  0x7b   :  { %3122 = vmatprep.mubr.msk.f32.mxu0 %vm106_vm0, %v93_v14 }
  0x7e   :  { %3123 = vmatmul.mubr.msk.f32.gmra.mxu0 %vm106_vm0, %v94_v15 }
  0x7f   :  { %3125 = vmatprep.mubr.msk.f32.mxu0 %vm106_vm0, %v95_v16 }
  0x82   :  { %3126 = vmatmul.mubr.msk.f32.gmra.mxu0 %vm106_vm0, %v96_v17 }
  0xc6   :  { %v3034_v22 = vpop.f32.mrf.mxu0 }
  0xc7   :  { %v371_v24 = vadd.f32 %v3034_v22, %v3880_v21 }
  0xc8   :  { %v365_v25 = vpop.f32.mrf.mxu0 }
  0xc9   :  { %v366_v26 = vadd.f32 %v3880_v21, %v365_v25  ;;  %v685_v31 = vmax.f32 %v371_v24, 0.0 }
  0xca   :  { %v3037_v27 = vpop.f32.mrf.mxu0 }
  0xcb   :  { %v684_v30 = vmax.f32 %v366_v26, 0.0  ;;  %v381_v32 = vadd.f32 %v3037_v27, %v3880_v21 }
  0xcc   :  { %v375_v33 = vpop.f32.mrf.mxu0 }
  0xcd   :  { %v376_v35 = vadd.f32 %v3880_v21, %v375_v33  ;;  %3160 = vmatprep.mubr.f32.mxu1 %v684_v30  ;;  %v687_v39 = vmax.f32 %v381_v32, 0.0 }
  0xce   :  { %v3040_v36 = vpop.f32.mrf.mxu0  ;;  %3161 = vmatmul.mubr.f32.vlgmr.msra.gmra.mxu1 %v685_v31 }
  0xcf   :  { %v686_v38 = vmax.f32 %v376_v35, 0.0  ;;  %v391_v40 = vadd.f32 %v3040_v36, %v3880_v21 }
  0xd0   :  { %v385_v41 = vpop.f32.mrf.mxu0 }
  0xd1   :  { %v386_v42 = vadd.f32 %v3880_v21, %v385_v41  ;;  %3163 = vmatprep.mubr.f32.mxu1 %v686_v38  ;;  %v689_v45 = vmax.f32 %v391_v40, 0.0 }
  0xd2   :  { %v3043_v43 = vpop.f32.mrf.mxu0  ;;  %3164 = vmatmul.mubr.f32.gmra.mxu1 %v687_v39 }
  0xd3   :  { %v688_v44 = vmax.f32 %v386_v42, 0.0  ;;  %v401_v46 = vadd.f32 %v3043_v43, %v3880_v21 }
  0xd4   :  { %v395_v47 = vpop.f32.mrf.mxu0 }
  0xd5   :  { %v396_v48 = vadd.f32 %v3880_v21, %v395_v47  ;;  %3166 = vmatprep.mubr.f32.mxu1 %v688_v44  ;;  %v691_v51 = vmax.f32 %v401_v46, 0.0 }
  0xd6   :  { %v3046_v49 = vpop.f32.mrf.mxu0  ;;  %3167 = vmatmul.mubr.f32.gmra.mxu1 %v689_v45 }
  0xd7   :  { %v690_v50 = vmax.f32 %v396_v48, 0.0  ;;  %v411_v52 = vadd.f32 %v3046_v49, %v3880_v21 }
  0xd8   :  { %v405_v53 = vpop.f32.mrf.mxu0 }
  0xd9   :  { %v406_v54 = vadd.f32 %v3880_v21, %v405_v53  ;;  %3169 = vmatprep.mubr.f32.mxu1 %v690_v50  ;;  %v693_v57 = vmax.f32 %v411_v52, 0.0 }
  0xda   :  { %v3049_v55 = vpop.f32.mrf.mxu0  ;;  %3170 = vmatmul.mubr.f32.gmra.mxu1 %v691_v51 }
  0xdb   :  { %v692_v56 = vmax.f32 %v406_v54, 0.0  ;;  %v421_v58 = vadd.f32 %v3049_v55, %v3880_v21 }
  0xdc   :  { %v415_v59 = vpop.f32.mrf.mxu0 }
  0xdd   :  { %v416_v60 = vadd.f32 %v3880_v21, %v415_v59  ;;  %3172 = vmatprep.mubr.f32.mxu1 %v692_v56  ;;  %v695_v63 = vmax.f32 %v421_v58, 0.0 }
  0xde   :  { %v3052_v61 = vpop.f32.mrf.mxu0  ;;  %3173 = vmatmul.mubr.f32.gmra.mxu1 %v693_v57 }
  0xdf   :  { %v694_v62 = vmax.f32 %v416_v60, 0.0  ;;  %v431_v0 = vadd.f32 %v3052_v61, %v3880_v21 }
  0xe0   :  { %v425_v1 = vpop.f32.mrf.mxu0 }
  0xe1   :  { %v426_v2 = vadd.f32 %v3880_v21, %v425_v1  ;;  %3175 = vmatprep.mubr.f32.mxu1 %v694_v62  ;;  %v697_v5 = vmax.f32 %v431_v0, 0.0 }
  0xe2   :  { %v3055_v3 = vpop.f32.mrf.mxu0  ;;  %3176 = vmatmul.mubr.f32.gmra.mxu1 %v695_v63 }
  0xe3   :  { %v696_v4 = vmax.f32 %v426_v2, 0.0  ;;  %v441_v6 = vadd.f32 %v3055_v3, %v3880_v21 }
  0xe4   :  { %v435_v7 = vpop.f32.mrf.mxu0 }
  0xe5   :  { %v436_v8 = vadd.f32 %v3880_v21, %v435_v7  ;;  %3178 = vmatprep.mubr.f32.mxu1 %v696_v4  ;;  %v699_v11 = vmax.f32 %v441_v6, 0.0 }
  0xe6   :  { %v3058_v9 = vpop.f32.mrf.mxu0  ;;  %3179 = vmatmul.mubr.f32.gmra.mxu1 %v697_v5 }
  0xe7   :  { %v698_v10 = vmax.f32 %v436_v8, 0.0  ;;  %v451_v12 = vadd.f32 %v3058_v9, %v3880_v21 }
  0xe8   :  { %v445_v13 = vpop.f32.mrf.mxu0 }
  0xe9   :  { %v446_v14 = vadd.f32 %v3880_v21, %v445_v13  ;;  %3181 = vmatprep.mubr.f32.mxu1 %v698_v10  ;;  %v701_v17 = vmax.f32 %v451_v12, 0.0 }
  0xea   :  { %v3061_v15 = vpop.f32.mrf.mxu0  ;;  %3182 = vmatmul.mubr.f32.gmra.mxu1 %v699_v11 }
  0xeb   :  { %v700_v16 = vmax.f32 %v446_v14, 0.0  ;;  %v461_v18 = vadd.f32 %v3061_v15, %v3880_v21 }
  0xec   :  { %v455_v19 = vpop.f32.mrf.mxu0 }
  0xed   :  { %v456_v20 = vadd.f32 %v3880_v21, %v455_v19  ;;  %3184 = vmatprep.mubr.f32.mxu1 %v700_v16  ;;  %v703_v24 = vmax.f32 %v461_v18, 0.0 }
  0xee   :  { %v3064_v22 = vpop.f32.mrf.mxu0  ;;  %3185 = vmatmul.mubr.f32.gmra.mxu1 %v701_v17 }
  0xef   :  { %v702_v23 = vmax.f32 %v456_v20, 0.0  ;;  %v471_v25 = vadd.f32 %v3064_v22, %v3880_v21 }
  0xf0   :  { %v465_v26 = vpop.f32.mrf.mxu0 }
  0xf1   :  { %v466_v27 = vadd.f32 %v3880_v21, %v465_v26  ;;  %3187 = vmatprep.mubr.f32.mxu1 %v702_v23  ;;  %v705_v30 = vmax.f32 %v471_v25, 0.0 }
  0xf2   :  { %v3067_v28 = vpop.f32.mrf.mxu0  ;;  %3188 = vmatmul.mubr.f32.gmra.mxu1 %v703_v24 }
  0xf3   :  { %v704_v29 = vmax.f32 %v466_v27, 0.0  ;;  %v481_v31 = vadd.f32 %v3067_v28, %v3880_v21 }
  0xf4   :  { %v475_v32 = vpop.f32.mrf.mxu0 }
  0xf5   :  { %v476_v33 = vadd.f32 %v3880_v21, %v475_v32  ;;  %3190 = vmatprep.mubr.f32.mxu1 %v704_v29  ;;  %v707_v36 = vmax.f32 %v481_v31, 0.0 }
  0xf6   :  { %v3070_v34 = vpop.f32.mrf.mxu0  ;;  %3191 = vmatmul.mubr.f32.gmra.mxu1 %v705_v30 }
  0xf7   :  { %v706_v35 = vmax.f32 %v476_v33, 0.0  ;;  %v491_v37 = vadd.f32 %v3070_v34, %v3880_v21 }
  0xf8   :  { %v485_v38 = vpop.f32.mrf.mxu0 }
  0xf9   :  { %v486_v39 = vadd.f32 %v3880_v21, %v485_v38  ;;  %3193 = vmatprep.mubr.f32.mxu1 %v706_v35  ;;  %v709_v42 = vmax.f32 %v491_v37, 0.0 }
  0xfa   :  { %v3073_v40 = vpop.f32.mrf.mxu0  ;;  %3194 = vmatmul.mubr.f32.gmra.mxu1 %v707_v36 }
  0xfb   :  { %v708_v41 = vmax.f32 %v486_v39, 0.0  ;;  %v501_v43 = vadd.f32 %v3073_v40, %v3880_v21 }
  0xfc   :  { %v495_v44 = vpop.f32.mrf.mxu0 }
  0xfd   :  { %v496_v45 = vadd.f32 %v3880_v21, %v495_v44  ;;  %3196 = vmatprep.mubr.f32.mxu1 %v708_v41  ;;  %v711_v48 = vmax.f32 %v501_v43, 0.0 }
  0xfe   :  { %v3076_v46 = vpop.f32.mrf.mxu0  ;;  %3197 = vmatmul.mubr.f32.gmra.mxu1 %v709_v42 }
  0xff   :  { %v710_v47 = vmax.f32 %v496_v45, 0.0  ;;  %v511_v49 = vadd.f32 %v3076_v46, %v3880_v21 }
 0x100   :  { %v505_v50 = vpop.f32.mrf.mxu0 }
 0x101   :  { %v506_v51 = vadd.f32 %v3880_v21, %v505_v50  ;;  %3199 = vmatprep.mubr.f32.mxu1 %v710_v47  ;;  %v713_v54 = vmax.f32 %v511_v49, 0.0 }
 0x102   :  { %v3079_v52 = vpop.f32.mrf.mxu0  ;;  %3200 = vmatmul.mubr.f32.gmra.mxu1 %v711_v48 }
 0x103   :  { %v712_v53 = vmax.f32 %v506_v51, 0.0  ;;  %v521_v55 = vadd.f32 %v3079_v52, %v3880_v21 }
 0x104   :  { %v515_v56 = vpop.f32.mrf.mxu0 }
 0x105   :  { %v516_v57 = vadd.f32 %v3880_v21, %v515_v56  ;;  %3202 = vmatprep.mubr.f32.mxu1 %v712_v53  ;;  %v715_v60 = vmax.f32 %v521_v55, 0.0 }
 0x106   :  { %v3082_v58 = vpop.f32.mrf.mxu0  ;;  %3203 = vmatmul.mubr.f32.gmra.mxu1 %v713_v54 }
 0x107   :  { %v714_v59 = vmax.f32 %v516_v57, 0.0  ;;  %v531_v61 = vadd.f32 %v3082_v58, %v3880_v21 }
 0x108   :  { %v525_v62 = vpop.f32.mrf.mxu0 }
 0x109   :  { %v526_v63 = vadd.f32 %v3880_v21, %v525_v62  ;;  %3205 = vmatprep.mubr.f32.mxu1 %v714_v59  ;;  %v717_v2 = vmax.f32 %v531_v61, 0.0 }
 0x10a   :  { %v3085_v0 = vpop.f32.mrf.mxu0  ;;  %3206 = vmatmul.mubr.f32.gmra.mxu1 %v715_v60 }
 0x10b   :  { %v716_v1 = vmax.f32 %v526_v63, 0.0  ;;  %v541_v3 = vadd.f32 %v3085_v0, %v3880_v21 }
 0x10c   :  { %v535_v4 = vpop.f32.mrf.mxu0 }
 0x10d   :  { %v536_v5 = vadd.f32 %v3880_v21, %v535_v4  ;;  %3208 = vmatprep.mubr.f32.mxu1 %v716_v1  ;;  %v719_v8 = vmax.f32 %v541_v3, 0.0 }
 0x10e   :  { %v3088_v6 = vpop.f32.mrf.mxu0  ;;  %3209 = vmatmul.mubr.f32.gmra.mxu1 %v717_v2 }
 0x10f   :  { %v718_v7 = vmax.f32 %v536_v5, 0.0  ;;  %v551_v9 = vadd.f32 %v3088_v6, %v3880_v21 }
 0x110   :  { %v545_v10 = vpop.f32.mrf.mxu0 }
 0x111   :  { %v546_v11 = vadd.f32 %v3880_v21, %v545_v10  ;;  %3211 = vmatprep.mubr.f32.mxu1 %v718_v7  ;;  %v721_v14 = vmax.f32 %v551_v9, 0.0 }
 0x112   :  { %v3091_v12 = vpop.f32.mrf.mxu0  ;;  %3212 = vmatmul.mubr.f32.gmra.mxu1 %v719_v8 }
 0x113   :  { %v720_v13 = vmax.f32 %v546_v11, 0.0  ;;  %v561_v15 = vadd.f32 %v3091_v12, %v3880_v21 }
 0x114   :  { %v555_v16 = vpop.f32.mrf.mxu0 }
 0x115   :  { %v556_v17 = vadd.f32 %v3880_v21, %v555_v16  ;;  %3214 = vmatprep.mubr.f32.mxu1 %v720_v13  ;;  %v723_v20 = vmax.f32 %v561_v15, 0.0 }
 0x116   :  { %v3094_v18 = vpop.f32.mrf.mxu0  ;;  %3215 = vmatmul.mubr.f32.gmra.mxu1 %v721_v14 }
 0x117   :  { %v722_v19 = vmax.f32 %v556_v17, 0.0  ;;  %v571_v22 = vadd.f32 %v3094_v18, %v3880_v21 }
 0x118   :  { %v565_v23 = vpop.f32.mrf.mxu0 }
 0x119   :  { %v566_v24 = vadd.f32 %v3880_v21, %v565_v23  ;;  %3217 = vmatprep.mubr.f32.mxu1 %v722_v19  ;;  %v725_v27 = vmax.f32 %v571_v22, 0.0 }
 0x11a   :  { %v3097_v25 = vpop.f32.mrf.mxu0  ;;  %3218 = vmatmul.mubr.f32.gmra.mxu1 %v723_v20 }
 0x11b   :  { %v724_v26 = vmax.f32 %v566_v24, 0.0  ;;  %v581_v28 = vadd.f32 %v3097_v25, %v3880_v21 }
 0x11c   :  { %v575_v29 = vpop.f32.mrf.mxu0 }
 0x11d   :  { %v576_v30 = vadd.f32 %v3880_v21, %v575_v29  ;;  %3220 = vmatprep.mubr.f32.mxu1 %v724_v26  ;;  %v727_v33 = vmax.f32 %v581_v28, 0.0 }
 0x11e   :  { %v3100_v31 = vpop.f32.mrf.mxu0  ;;  %3221 = vmatmul.mubr.f32.gmra.mxu1 %v725_v27 }
 0x11f   :  { %v726_v32 = vmax.f32 %v576_v30, 0.0  ;;  %v591_v34 = vadd.f32 %v3100_v31, %v3880_v21  ;;  %v1880_v30 = vld [vmem:[%s4318_s7 + $0x18] sm:$0xff]  ;;  %v1879_v31 = vld [vmem:[%s4318_s7 + $0x10] sm:$0xff] }
 0x120   :  { %v585_v35 = vpop.f32.mrf.mxu0  ;;  %3472 = vmatprep.subr.mxu1 %v1880_v30  ;;  %3368 = vmatprep.subr.mxu0 %v1880_v30 }
 0x121   :  { %v586_v36 = vadd.f32 %v3880_v21, %v585_v35  ;;  %3223 = vmatprep.mubr.f32.mxu1 %v726_v32  ;;  %v729_v39 = vmax.f32 %v591_v34, 0.0  ;;  %3476 = vmatpush3.msra.mxu1 %v1880_v30 }
 0x122   :  { %v3103_v37 = vpop.f32.mrf.mxu0  ;;  %3224 = vmatmul.mubr.f32.gmra.mxu1 %v727_v33  ;;  %3473 = vmatprep.subr.mxu1 %v1879_v31 }
 0x123   :  { %v728_v38 = vmax.f32 %v586_v36, 0.0  ;;  %v601_v40 = vadd.f32 %v3103_v37, %v3880_v21  ;;  %3477 = vmatpush3.msra.mxu1 %v1879_v31  ;;  %v1878_v37 = vld [vmem:[%s4318_s7 + $0x8] sm:$0xff] }
 0x124   :  { %v595_v41 = vpop.f32.mrf.mxu0  ;;  %3474 = vmatprep.subr.mxu1 %v1878_v37 }
 0x125   :  { %v596_v42 = vadd.f32 %v3880_v21, %v595_v41  ;;  %3226 = vmatprep.mubr.f32.mxu1 %v728_v38  ;;  %v731_v45 = vmax.f32 %v601_v40, 0.0  ;;  %3478 = vmatpush3.msra.mxu1 %v1878_v37 }
 0x126   :  { %v3106_v43 = vpop.f32.mrf.mxu0  ;;  %3227 = vmatmul.mubr.f32.gmra.mxu1 %v729_v39 }
 0x127   :  { %v730_v44 = vmax.f32 %v596_v42, 0.0  ;;  %v611_v46 = vadd.f32 %v3106_v43, %v3880_v21  ;;  %v1877_v42 = vld [vmem:[%s4318_s7] sm:$0xff] }
 0x128   :  { %v605_v47 = vpop.f32.mrf.mxu0  ;;  %3475 = vmatprep.subr.mxu1 %v1877_v42 }
 0x129   :  { %v606_v48 = vadd.f32 %v3880_v21, %v605_v47  ;;  %3229 = vmatprep.mubr.f32.mxu1 %v730_v44  ;;  %v733_v51 = vmax.f32 %v611_v46, 0.0  ;;  %3479 = vmatpush3.msra.mxu1 %v1877_v42 }
 0x12a   :  { %v3109_v49 = vpop.f32.mrf.mxu0  ;;  %3230 = vmatmul.mubr.f32.gmra.mxu1 %v731_v45 }
 0x12b   :  { %v732_v50 = vmax.f32 %v606_v48, 0.0  ;;  %v621_v52 = vadd.f32 %v3109_v49, %v3880_v21 }
 0x12c   :  { %v615_v53 = vpop.f32.mrf.mxu0 }
 0x12d   :  { %v616_v54 = vadd.f32 %v3880_v21, %v615_v53  ;;  %3232 = vmatprep.mubr.f32.mxu1 %v732_v50  ;;  %v735_v57 = vmax.f32 %v621_v52, 0.0 }
 0x12e   :  { %v3112_v55 = vpop.f32.mrf.mxu0  ;;  %3233 = vmatmul.mubr.f32.gmra.mxu1 %v733_v51 }
 0x12f   :  { %v734_v56 = vmax.f32 %v616_v54, 0.0  ;;  %v631_v58 = vadd.f32 %v3112_v55, %v3880_v21 }
 0x130   :  { %v625_v59 = vpop.f32.mrf.mxu0 }
 0x131   :  { %v626_v60 = vadd.f32 %v3880_v21, %v625_v59  ;;  %3235 = vmatprep.mubr.f32.mxu1 %v734_v56  ;;  %v737_v63 = vmax.f32 %v631_v58, 0.0 }
 0x132   :  { %v3115_v61 = vpop.f32.mrf.mxu0  ;;  %3236 = vmatmul.mubr.f32.gmra.mxu1 %v735_v57 }
 0x133   :  { %v736_v62 = vmax.f32 %v626_v60, 0.0  ;;  %v641_v0 = vadd.f32 %v3115_v61, %v3880_v21 }
 0x134   :  { %v635_v1 = vpop.f32.mrf.mxu0 }
 0x135   :  { %v636_v2 = vadd.f32 %v3880_v21, %v635_v1  ;;  %3238 = vmatprep.mubr.f32.mxu1 %v736_v62  ;;  %v739_v5 = vmax.f32 %v641_v0, 0.0 }
 0x136   :  { %v3118_v3 = vpop.f32.mrf.mxu0  ;;  %3239 = vmatmul.mubr.f32.gmra.mxu1 %v737_v63 }
 0x137   :  { %v738_v4 = vmax.f32 %v636_v2, 0.0  ;;  %v651_v6 = vadd.f32 %v3118_v3, %v3880_v21 }
 0x138   :  { %v645_v7 = vpop.f32.mrf.mxu0 }
 0x139   :  { %v646_v8 = vadd.f32 %v3880_v21, %v645_v7  ;;  %3241 = vmatprep.mubr.f32.mxu1 %v738_v4  ;;  %v741_v11 = vmax.f32 %v651_v6, 0.0 }
 0x13a   :  { %v3121_v9 = vpop.f32.mrf.mxu0  ;;  %3242 = vmatmul.mubr.f32.gmra.mxu1 %v739_v5 }
 0x13b   :  { %v740_v10 = vmax.f32 %v646_v8, 0.0  ;;  %v661_v12 = vadd.f32 %v3121_v9, %v3880_v21 }
 0x13c   :  { %v655_v13 = vpop.f32.mrf.mxu0 }
 0x13d   :  { %v656_v14 = vadd.f32 %v3880_v21, %v655_v13  ;;  %3244 = vmatprep.mubr.f32.mxu1 %v740_v10  ;;  %v743_v17 = vmax.f32 %v661_v12, 0.0 }
 0x13e   :  { %v3124_v15 = vpop.f32.mrf.mxu0  ;;  %3245 = vmatmul.mubr.f32.gmra.mxu1 %v741_v11 }
 0x13f   :  { %v742_v16 = vmax.f32 %v656_v14, 0.0  ;;  %v671_v18 = vadd.f32 %v3124_v15, %v3880_v21 }
 0x140   :  { %v665_v19 = vpop.f32.mrf.mxu0 }
 0x141   :  { %v666_v20 = vadd.f32 %v3880_v21, %v665_v19  ;;  %3247 = vmatprep.mubr.f32.mxu1 %v742_v16  ;;  %v745_v24 = vmax.f32 %v671_v18, 0.0 }
 0x142   :  { %v3127_v22 = vpop.f32.mrf.mxu0  ;;  %3248 = vmatmul.mubr.f32.gmra.mxu1 %v743_v17 }
 0x143   :  { %v744_v23 = vmax.f32 %v666_v20, 0.0  ;;  %v681_v25 = vadd.f32 %v3127_v22, %v3880_v21 }
 0x144   :  { %v675_v26 = vpop.f32.mrf.mxu0 }
 0x145   :  { %v676_v27 = vadd.f32 %v3880_v21, %v675_v26  ;;  %3250 = vmatprep.mubr.f32.mxu1 %v744_v23  ;;  %v747_v29 = vmax.f32 %v681_v25, 0.0  ;;  %v3970_v21 = vld [vmem:[%s4315_s4] ss:$0 sm:$0xff] }
 0x146   :  { %3251 = vmatmul.mubr.f32.gmra.mxu1 %v745_v24 }
 0x147   :  { %v746_v28 = vmax.f32 %v676_v27, 0.0 }
 0x149   :  { %3253 = vmatprep.mubr.f32.mxu1 %v746_v28 }
 0x14a   :  { %3254 = vmatmul.mubr.f32.gmra.mxu1 %v747_v29 }
 0x18e   :  { %v3162_v32 = vpop.f32.mrf.mxu1 }
 0x18f   :  { %v843_v33 = vadd.f32 %v3162_v32, %v3970_v21 }
 0x190   :  { %v837_v34 = vpop.f32.mrf.mxu1 }
 0x191   :  { %v838_v35 = vadd.f32 %v3970_v21, %v837_v34  ;;  %v1157_v39 = vmax.f32 %v843_v33, 0.0 }
 0x192   :  { %v3165_v36 = vpop.f32.mrf.mxu1 }
 0x193   :  { %v1156_v38 = vmax.f32 %v838_v35, 0.0  ;;  %v853_v40 = vadd.f32 %v3165_v36, %v3970_v21 }
 0x194   :  { %v847_v41 = vpop.f32.mrf.mxu1 }
 0x195   :  { %v848_v43 = vadd.f32 %v3970_v21, %v847_v41  ;;  %3272 = vmatprep.mubr.msk.f32.mxu0 %vm1235_vm1, %v1156_v38  ;;  %v1159_v46 = vmax.f32 %v853_v40, 0.0 }
 0x196   :  { %v3168_v44 = vpop.f32.mrf.mxu1  ;;  %3273 = vmatmul.mubr.msk.f32.vlgmr.msra.gmra.mxu0 %vm1235_vm1, %v1157_v39 }
 0x197   :  { %v1158_v45 = vmax.f32 %v848_v43, 0.0  ;;  %3369 = vmatpush3.msra.mxu0 %v1880_v30  ;;  %v863_v47 = vadd.f32 %v3168_v44, %v3970_v21 }
 0x198   :  { %v857_v48 = vpop.f32.mrf.mxu1  ;;  %3370 = vmatprep.subr.mxu0 %v1879_v31 }
 0x199   :  { %v858_v49 = vadd.f32 %v3970_v21, %v857_v48  ;;  %3275 = vmatprep.mubr.msk.f32.mxu0 %vm1235_vm1, %v1158_v45  ;;  %3371 = vmatpush3.msra.mxu0 %v1879_v31  ;;  %v1161_v52 = vmax.f32 %v863_v47, 0.0 }
 0x19a   :  { %v3171_v50 = vpop.f32.mrf.mxu1  ;;  %3276 = vmatmul.mubr.msk.f32.gmra.mxu0 %vm1235_vm1, %v1159_v46  ;;  %3372 = vmatprep.subr.mxu0 %v1878_v37 }
 0x19b   :  { %v1160_v51 = vmax.f32 %v858_v49, 0.0  ;;  %3373 = vmatpush3.msra.mxu0 %v1878_v37  ;;  %v873_v53 = vadd.f32 %v3171_v50, %v3970_v21 }
 0x19c   :  { %v867_v54 = vpop.f32.mrf.mxu1  ;;  %3374 = vmatprep.subr.mxu0 %v1877_v42 }
 0x19d   :  { %v868_v55 = vadd.f32 %v3970_v21, %v867_v54  ;;  %3278 = vmatprep.mubr.msk.f32.mxu0 %vm1235_vm1, %v1160_v51  ;;  %3375 = vmatpush3.msra.mxu0 %v1877_v42  ;;  %v1163_v58 = vmax.f32 %v873_v53, 0.0 }
 0x19e   :  { %v3174_v56 = vpop.f32.mrf.mxu1  ;;  %3279 = vmatmul.mubr.msk.f32.gmra.mxu0 %vm1235_vm1, %v1161_v52 }
 0x19f   :  { %v1162_v57 = vmax.f32 %v868_v55, 0.0  ;;  %v883_v59 = vadd.f32 %v3174_v56, %v3970_v21 }
 0x1a0   :  { %v877_v60 = vpop.f32.mrf.mxu1 }
 0x1a1   :  { %v878_v61 = vadd.f32 %v3970_v21, %v877_v60  ;;  %3281 = vmatprep.mubr.msk.f32.mxu0 %vm1235_vm1, %v1162_v57  ;;  %v1165_v0 = vmax.f32 %v883_v59, 0.0 }
 0x1a2   :  { %v3177_v62 = vpop.f32.mrf.mxu1  ;;  %3282 = vmatmul.mubr.msk.f32.gmra.mxu0 %vm1235_vm1, %v1163_v58 }
 0x1a3   :  { %v1164_v63 = vmax.f32 %v878_v61, 0.0  ;;  %v893_v1 = vadd.f32 %v3177_v62, %v3970_v21 }
 0x1a4   :  { %v887_v2 = vpop.f32.mrf.mxu1 }
 0x1a5   :  { %v888_v3 = vadd.f32 %v3970_v21, %v887_v2  ;;  %3284 = vmatprep.mubr.msk.f32.mxu0 %vm1235_vm1, %v1164_v63  ;;  %v1167_v6 = vmax.f32 %v893_v1, 0.0 }
 0x1a6   :  { %v3180_v4 = vpop.f32.mrf.mxu1  ;;  %3285 = vmatmul.mubr.msk.f32.gmra.mxu0 %vm1235_vm1, %v1165_v0 }
 0x1a7   :  { %v1166_v5 = vmax.f32 %v888_v3, 0.0  ;;  %v903_v7 = vadd.f32 %v3180_v4, %v3970_v21 }
 0x1a8   :  { %v897_v8 = vpop.f32.mrf.mxu1 }
 0x1a9   :  { %v898_v9 = vadd.f32 %v3970_v21, %v897_v8  ;;  %3287 = vmatprep.mubr.msk.f32.mxu0 %vm1235_vm1, %v1166_v5  ;;  %v1169_v12 = vmax.f32 %v903_v7, 0.0 }
 0x1aa   :  { %v3183_v10 = vpop.f32.mrf.mxu1  ;;  %3288 = vmatmul.mubr.msk.f32.gmra.mxu0 %vm1235_vm1, %v1167_v6 }
 0x1ab   :  { %v1168_v11 = vmax.f32 %v898_v9, 0.0  ;;  %v913_v13 = vadd.f32 %v3183_v10, %v3970_v21 }
 0x1ac   :  { %v907_v14 = vpop.f32.mrf.mxu1 }
 0x1ad   :  { %v908_v15 = vadd.f32 %v3970_v21, %v907_v14  ;;  %3290 = vmatprep.mubr.msk.f32.mxu0 %vm1235_vm1, %v1168_v11  ;;  %v1171_v18 = vmax.f32 %v913_v13, 0.0 }
 0x1ae   :  { %v3186_v16 = vpop.f32.mrf.mxu1  ;;  %3291 = vmatmul.mubr.msk.f32.gmra.mxu0 %vm1235_vm1, %v1169_v12 }
 0x1af   :  { %v1170_v17 = vmax.f32 %v908_v15, 0.0  ;;  %v923_v19 = vadd.f32 %v3186_v16, %v3970_v21 }
 0x1b0   :  { %v917_v20 = vpop.f32.mrf.mxu1 }
 0x1b1   :  { %v918_v22 = vadd.f32 %v3970_v21, %v917_v20  ;;  %3293 = vmatprep.mubr.msk.f32.mxu0 %vm1235_vm1, %v1170_v17  ;;  %v1173_v25 = vmax.f32 %v923_v19, 0.0 }
 0x1b2   :  { %v3189_v23 = vpop.f32.mrf.mxu1  ;;  %3294 = vmatmul.mubr.msk.f32.gmra.mxu0 %vm1235_vm1, %v1171_v18 }
 0x1b3   :  { %v1172_v24 = vmax.f32 %v918_v22, 0.0  ;;  %v933_v26 = vadd.f32 %v3189_v23, %v3970_v21 }
 0x1b4   :  { %v927_v27 = vpop.f32.mrf.mxu1 }
 0x1b5   :  { %v928_v28 = vadd.f32 %v3970_v21, %v927_v27  ;;  %3296 = vmatprep.mubr.msk.f32.mxu0 %vm1235_vm1, %v1172_v24  ;;  %v1175_v31 = vmax.f32 %v933_v26, 0.0 }
 0x1b6   :  { %v3192_v29 = vpop.f32.mrf.mxu1  ;;  %3297 = vmatmul.mubr.msk.f32.gmra.mxu0 %vm1235_vm1, %v1173_v25 }
 0x1b7   :  { %v1174_v30 = vmax.f32 %v928_v28, 0.0  ;;  %v943_v32 = vadd.f32 %v3192_v29, %v3970_v21 }
 0x1b8   :  { %v937_v33 = vpop.f32.mrf.mxu1 }
 0x1b9   :  { %v938_v34 = vadd.f32 %v3970_v21, %v937_v33  ;;  %3299 = vmatprep.mubr.msk.f32.mxu0 %vm1235_vm1, %v1174_v30  ;;  %v1177_v37 = vmax.f32 %v943_v32, 0.0 }
 0x1ba   :  { %v3195_v35 = vpop.f32.mrf.mxu1  ;;  %3300 = vmatmul.mubr.msk.f32.gmra.mxu0 %vm1235_vm1, %v1175_v31 }
 0x1bb   :  { %v1176_v36 = vmax.f32 %v938_v34, 0.0  ;;  %v953_v38 = vadd.f32 %v3195_v35, %v3970_v21 }
 0x1bc   :  { %v947_v39 = vpop.f32.mrf.mxu1 }
 0x1bd   :  { %v948_v40 = vadd.f32 %v3970_v21, %v947_v39  ;;  %3302 = vmatprep.mubr.msk.f32.mxu0 %vm1235_vm1, %v1176_v36  ;;  %v1179_v43 = vmax.f32 %v953_v38, 0.0 }
 0x1be   :  { %v3198_v41 = vpop.f32.mrf.mxu1  ;;  %3303 = vmatmul.mubr.msk.f32.gmra.mxu0 %vm1235_vm1, %v1177_v37 }
 0x1bf   :  { %v1178_v42 = vmax.f32 %v948_v40, 0.0  ;;  %v963_v44 = vadd.f32 %v3198_v41, %v3970_v21 }
 0x1c0   :  { %v957_v45 = vpop.f32.mrf.mxu1 }
 0x1c1   :  { %v958_v46 = vadd.f32 %v3970_v21, %v957_v45  ;;  %3305 = vmatprep.mubr.msk.f32.mxu0 %vm1235_vm1, %v1178_v42  ;;  %v1181_v49 = vmax.f32 %v963_v44, 0.0 }
 0x1c2   :  { %v3201_v47 = vpop.f32.mrf.mxu1  ;;  %3306 = vmatmul.mubr.msk.f32.gmra.mxu0 %vm1235_vm1, %v1179_v43 }
 0x1c3   :  { %v1180_v48 = vmax.f32 %v958_v46, 0.0  ;;  %v973_v50 = vadd.f32 %v3201_v47, %v3970_v21 }
 0x1c4   :  { %v967_v51 = vpop.f32.mrf.mxu1 }
 0x1c5   :  { %v968_v52 = vadd.f32 %v3970_v21, %v967_v51  ;;  %3308 = vmatprep.mubr.msk.f32.mxu0 %vm1235_vm1, %v1180_v48  ;;  %v1183_v55 = vmax.f32 %v973_v50, 0.0 }
 0x1c6   :  { %v3204_v53 = vpop.f32.mrf.mxu1  ;;  %3309 = vmatmul.mubr.msk.f32.gmra.mxu0 %vm1235_vm1, %v1181_v49 }
 0x1c7   :  { %v1182_v54 = vmax.f32 %v968_v52, 0.0  ;;  %v983_v56 = vadd.f32 %v3204_v53, %v3970_v21 }
 0x1c8   :  { %v977_v57 = vpop.f32.mrf.mxu1 }
 0x1c9   :  { %v978_v58 = vadd.f32 %v3970_v21, %v977_v57  ;;  %3311 = vmatprep.mubr.msk.f32.mxu0 %vm1235_vm1, %v1182_v54  ;;  %v1185_v61 = vmax.f32 %v983_v56, 0.0 }
 0x1ca   :  { %v3207_v59 = vpop.f32.mrf.mxu1  ;;  %3312 = vmatmul.mubr.msk.f32.gmra.mxu0 %vm1235_vm1, %v1183_v55 }
 0x1cb   :  { %v1184_v60 = vmax.f32 %v978_v58, 0.0  ;;  %v993_v62 = vadd.f32 %v3207_v59, %v3970_v21 }
 0x1cc   :  { %v987_v63 = vpop.f32.mrf.mxu1 }
 0x1cd   :  { %v988_v0 = vadd.f32 %v3970_v21, %v987_v63  ;;  %3314 = vmatprep.mubr.msk.f32.mxu0 %vm1235_vm1, %v1184_v60  ;;  %v1187_v3 = vmax.f32 %v993_v62, 0.0 }
 0x1ce   :  { %v3210_v1 = vpop.f32.mrf.mxu1  ;;  %3315 = vmatmul.mubr.msk.f32.gmra.mxu0 %vm1235_vm1, %v1185_v61 }
 0x1cf   :  { %v1186_v2 = vmax.f32 %v988_v0, 0.0  ;;  %v1003_v4 = vadd.f32 %v3210_v1, %v3970_v21 }
 0x1d0   :  { %v997_v5 = vpop.f32.mrf.mxu1 }
 0x1d1   :  { %v998_v6 = vadd.f32 %v3970_v21, %v997_v5  ;;  %3317 = vmatprep.mubr.msk.f32.mxu0 %vm1235_vm1, %v1186_v2  ;;  %v1189_v9 = vmax.f32 %v1003_v4, 0.0 }
 0x1d2   :  { %v3213_v7 = vpop.f32.mrf.mxu1  ;;  %3318 = vmatmul.mubr.msk.f32.gmra.mxu0 %vm1235_vm1, %v1187_v3 }
 0x1d3   :  { %v1188_v8 = vmax.f32 %v998_v6, 0.0  ;;  %v1013_v10 = vadd.f32 %v3213_v7, %v3970_v21 }
 0x1d4   :  { %v1007_v11 = vpop.f32.mrf.mxu1 }
 0x1d5   :  { %v1008_v12 = vadd.f32 %v3970_v21, %v1007_v11  ;;  %3320 = vmatprep.mubr.msk.f32.mxu0 %vm1235_vm1, %v1188_v8  ;;  %v1191_v15 = vmax.f32 %v1013_v10, 0.0 }
 0x1d6   :  { %v3216_v13 = vpop.f32.mrf.mxu1  ;;  %3321 = vmatmul.mubr.msk.f32.gmra.mxu0 %vm1235_vm1, %v1189_v9 }
 0x1d7   :  { %v1190_v14 = vmax.f32 %v1008_v12, 0.0  ;;  %v1023_v16 = vadd.f32 %v3216_v13, %v3970_v21 }
 0x1d8   :  { %v1017_v17 = vpop.f32.mrf.mxu1 }
 0x1d9   :  { %v1018_v18 = vadd.f32 %v3970_v21, %v1017_v17  ;;  %3323 = vmatprep.mubr.msk.f32.mxu0 %vm1235_vm1, %v1190_v14  ;;  %v1193_v22 = vmax.f32 %v1023_v16, 0.0 }
 0x1da   :  { %v3219_v19 = vpop.f32.mrf.mxu1  ;;  %3324 = vmatmul.mubr.msk.f32.gmra.mxu0 %vm1235_vm1, %v1191_v15 }
 0x1db   :  { %v1192_v20 = vmax.f32 %v1018_v18, 0.0  ;;  %v1033_v23 = vadd.f32 %v3219_v19, %v3970_v21 }
 0x1dc   :  { %v1027_v24 = vpop.f32.mrf.mxu1 }
 0x1dd   :  { %v1028_v25 = vadd.f32 %v3970_v21, %v1027_v24  ;;  %3326 = vmatprep.mubr.msk.f32.mxu0 %vm1235_vm1, %v1192_v20  ;;  %v1195_v28 = vmax.f32 %v1033_v23, 0.0 }
 0x1de   :  { %v3222_v26 = vpop.f32.mrf.mxu1  ;;  %3327 = vmatmul.mubr.msk.f32.gmra.mxu0 %vm1235_vm1, %v1193_v22 }
 0x1df   :  { %v1194_v27 = vmax.f32 %v1028_v25, 0.0  ;;  %v1043_v29 = vadd.f32 %v3222_v26, %v3970_v21 }
 0x1e0   :  { %v1037_v30 = vpop.f32.mrf.mxu1 }
 0x1e1   :  { %v1038_v31 = vadd.f32 %v3970_v21, %v1037_v30  ;;  %3329 = vmatprep.mubr.msk.f32.mxu0 %vm1235_vm1, %v1194_v27  ;;  %v1197_v34 = vmax.f32 %v1043_v29, 0.0 }
 0x1e2   :  { %v3225_v32 = vpop.f32.mrf.mxu1  ;;  %3330 = vmatmul.mubr.msk.f32.gmra.mxu0 %vm1235_vm1, %v1195_v28 }
 0x1e3   :  { %v1196_v33 = vmax.f32 %v1038_v31, 0.0  ;;  %v1053_v35 = vadd.f32 %v3225_v32, %v3970_v21 }
 0x1e4   :  { %v1047_v36 = vpop.f32.mrf.mxu1 }
 0x1e5   :  { %v1048_v37 = vadd.f32 %v3970_v21, %v1047_v36  ;;  %3332 = vmatprep.mubr.msk.f32.mxu0 %vm1235_vm1, %v1196_v33  ;;  %v1199_v40 = vmax.f32 %v1053_v35, 0.0 }
 0x1e6   :  { %v3228_v38 = vpop.f32.mrf.mxu1  ;;  %3333 = vmatmul.mubr.msk.f32.gmra.mxu0 %vm1235_vm1, %v1197_v34 }
 0x1e7   :  { %v1198_v39 = vmax.f32 %v1048_v37, 0.0  ;;  %v1063_v41 = vadd.f32 %v3228_v38, %v3970_v21  ;;  %v4109_v37 = vld [vmem:[%s4317_s6] ss:$0 sm:$0xff] }
 0x1e8   :  { %v1057_v42 = vpop.f32.mrf.mxu1 }
 0x1e9   :  { %v1058_v43 = vadd.f32 %v3970_v21, %v1057_v42  ;;  %3335 = vmatprep.mubr.msk.f32.mxu0 %vm1235_vm1, %v1198_v39  ;;  %v1201_v46 = vmax.f32 %v1063_v41, 0.0 }
 0x1ea   :  { %v3231_v44 = vpop.f32.mrf.mxu1  ;;  %3336 = vmatmul.mubr.msk.f32.gmra.mxu0 %vm1235_vm1, %v1199_v40 }
 0x1eb   :  { %v1200_v45 = vmax.f32 %v1058_v43, 0.0  ;;  %v1073_v47 = vadd.f32 %v3231_v44, %v3970_v21 }
 0x1ec   :  { %v1067_v48 = vpop.f32.mrf.mxu1 }
 0x1ed   :  { %v1068_v49 = vadd.f32 %v3970_v21, %v1067_v48  ;;  %3338 = vmatprep.mubr.msk.f32.mxu0 %vm1235_vm1, %v1200_v45  ;;  %v1203_v52 = vmax.f32 %v1073_v47, 0.0 }
 0x1ee   :  { %v3234_v50 = vpop.f32.mrf.mxu1  ;;  %3339 = vmatmul.mubr.msk.f32.gmra.mxu0 %vm1235_vm1, %v1201_v46 }
 0x1ef   :  { %v1202_v51 = vmax.f32 %v1068_v49, 0.0  ;;  %v1083_v53 = vadd.f32 %v3234_v50, %v3970_v21 }
 0x1f0   :  { %v1077_v54 = vpop.f32.mrf.mxu1 }
 0x1f1   :  { %v1078_v55 = vadd.f32 %v3970_v21, %v1077_v54  ;;  %3341 = vmatprep.mubr.msk.f32.mxu0 %vm1235_vm1, %v1202_v51  ;;  %v1205_v58 = vmax.f32 %v1083_v53, 0.0 }
 0x1f2   :  { %v3237_v56 = vpop.f32.mrf.mxu1  ;;  %3342 = vmatmul.mubr.msk.f32.gmra.mxu0 %vm1235_vm1, %v1203_v52 }
 0x1f3   :  { %v1204_v57 = vmax.f32 %v1078_v55, 0.0  ;;  %v1093_v59 = vadd.f32 %v3237_v56, %v3970_v21 }
 0x1f4   :  { %v1087_v60 = vpop.f32.mrf.mxu1 }
 0x1f5   :  { %v1088_v61 = vadd.f32 %v3970_v21, %v1087_v60  ;;  %3344 = vmatprep.mubr.msk.f32.mxu0 %vm1235_vm1, %v1204_v57  ;;  %v1207_v0 = vmax.f32 %v1093_v59, 0.0 }
 0x1f6   :  { %v3240_v62 = vpop.f32.mrf.mxu1  ;;  %3345 = vmatmul.mubr.msk.f32.gmra.mxu0 %vm1235_vm1, %v1205_v58 }
 0x1f7   :  { %v1206_v63 = vmax.f32 %v1088_v61, 0.0  ;;  %v1103_v1 = vadd.f32 %v3240_v62, %v3970_v21 }
 0x1f8   :  { %v1097_v2 = vpop.f32.mrf.mxu1 }
 0x1f9   :  { %v1098_v3 = vadd.f32 %v3970_v21, %v1097_v2  ;;  %3347 = vmatprep.mubr.msk.f32.mxu0 %vm1235_vm1, %v1206_v63  ;;  %v1209_v6 = vmax.f32 %v1103_v1, 0.0 }
 0x1fa   :  { %v3243_v4 = vpop.f32.mrf.mxu1  ;;  %3348 = vmatmul.mubr.msk.f32.gmra.mxu0 %vm1235_vm1, %v1207_v0 }
 0x1fb   :  { %v1208_v5 = vmax.f32 %v1098_v3, 0.0  ;;  %v1113_v7 = vadd.f32 %v3243_v4, %v3970_v21 }
 0x1fc   :  { %v1107_v8 = vpop.f32.mrf.mxu1 }
 0x1fd   :  { %v1108_v9 = vadd.f32 %v3970_v21, %v1107_v8  ;;  %3350 = vmatprep.mubr.msk.f32.mxu0 %vm1235_vm1, %v1208_v5  ;;  %v1211_v12 = vmax.f32 %v1113_v7, 0.0 }
 0x1fe   :  { %v3246_v10 = vpop.f32.mrf.mxu1  ;;  %3351 = vmatmul.mubr.msk.f32.gmra.mxu0 %vm1235_vm1, %v1209_v6 }
 0x1ff   :  { %v1210_v11 = vmax.f32 %v1108_v9, 0.0  ;;  %v1123_v13 = vadd.f32 %v3246_v10, %v3970_v21 }
 0x200   :  { %v1117_v14 = vpop.f32.mrf.mxu1 }
 0x201   :  { %v1118_v15 = vadd.f32 %v3970_v21, %v1117_v14  ;;  %3353 = vmatprep.mubr.msk.f32.mxu0 %vm1235_vm1, %v1210_v11  ;;  %v1213_v18 = vmax.f32 %v1123_v13, 0.0 }
 0x202   :  { %v3249_v16 = vpop.f32.mrf.mxu1  ;;  %3354 = vmatmul.mubr.msk.f32.gmra.mxu0 %vm1235_vm1, %v1211_v12 }
 0x203   :  { %v1212_v17 = vmax.f32 %v1118_v15, 0.0  ;;  %v1133_v19 = vadd.f32 %v3249_v16, %v3970_v21 }
 0x204   :  { %v1127_v20 = vpop.f32.mrf.mxu1 }
 0x205   :  { %v1128_v22 = vadd.f32 %v3970_v21, %v1127_v20  ;;  %3356 = vmatprep.mubr.msk.f32.mxu0 %vm1235_vm1, %v1212_v17  ;;  %v1215_v25 = vmax.f32 %v1133_v19, 0.0 }
 0x206   :  { %v3252_v23 = vpop.f32.mrf.mxu1  ;;  %3357 = vmatmul.mubr.msk.f32.gmra.mxu0 %vm1235_vm1, %v1213_v18 }
 0x207   :  { %v1214_v24 = vmax.f32 %v1128_v22, 0.0  ;;  %v1143_v26 = vadd.f32 %v3252_v23, %v3970_v21 }
 0x208   :  { %v1137_v27 = vpop.f32.mrf.mxu1 }
 0x209   :  { %v1138_v28 = vadd.f32 %v3970_v21, %v1137_v27  ;;  %3359 = vmatprep.mubr.msk.f32.mxu0 %vm1235_vm1, %v1214_v24  ;;  %v1217_v31 = vmax.f32 %v1143_v26, 0.0 }
 0x20a   :  { %v3255_v29 = vpop.f32.mrf.mxu1  ;;  %3360 = vmatmul.mubr.msk.f32.gmra.mxu0 %vm1235_vm1, %v1215_v25 }
 0x20b   :  { %v1216_v30 = vmax.f32 %v1138_v28, 0.0  ;;  %v1153_v32 = vadd.f32 %v3255_v29, %v3970_v21 }
 0x20c   :  { %v1147_v33 = vpop.f32.mrf.mxu1 }
 0x20d   :  { %v1148_v34 = vadd.f32 %v3970_v21, %v1147_v33  ;;  %3362 = vmatprep.mubr.msk.f32.mxu0 %vm1235_vm1, %v1216_v30  ;;  %v1219_v36 = vmax.f32 %v1153_v32, 0.0 }
 0x20e   :  { %3363 = vmatmul.mubr.msk.f32.gmra.mxu0 %vm1235_vm1, %v1217_v31 }
 0x20f   :  { %v1218_v35 = vmax.f32 %v1148_v34, 0.0 }
 0x211   :  { %3365 = vmatprep.mubr.msk.f32.mxu0 %vm1235_vm1, %v1218_v35 }
 0x212   :  { %3366 = vmatmul.mubr.msk.f32.gmra.mxu0 %vm1235_vm1, %v1219_v36 }
 0x256   :  { %v3274_v38 = vpop.f32.mrf.mxu0 }
 0x257   :  { %v1500_v39 = vadd.f32 %v3274_v38, %v4109_v37 }
 0x258   :  { %v1494_v40 = vpop.f32.mrf.mxu0 }
 0x259   :  { %v1495_v21 = vadd.f32 %v4109_v37, %v1494_v40  ;;  %v1814_v43 = vmax.f32 %v1500_v39, 0.0 }
 0x25a   :  { %v3277_v41 = vpop.f32.mrf.mxu0 }
 0x25b   :  { %v1813_v42 = vmax.f32 %v1495_v21, 0.0  ;;  %v1510_v44 = vadd.f32 %v3277_v41, %v4109_v37 }
 0x25c   :  { %v1504_v45 = vpop.f32.mrf.mxu0 }
 0x25d   :  { %v1505_v46 = vadd.f32 %v4109_v37, %v1504_v45  ;;  %3376 = vmatprep.mubr.msk.f32.mxu0 %vm1888_vm2, %v1813_v42  ;;  %v1816_v49 = vmax.f32 %v1510_v44, 0.0 }
 0x25e   :  { %v3280_v47 = vpop.f32.mrf.mxu0  ;;  %3377 = vmatmul.mubr.msk.f32.vlgmr.msra.gmra.mxu0 %vm1888_vm2, %v1814_v43 }
 0x25f   :  { %v1815_v48 = vmax.f32 %v1505_v46, 0.0  ;;  %v1520_v50 = vadd.f32 %v3280_v47, %v4109_v37 }
 0x260   :  { %v1514_v51 = vpop.f32.mrf.mxu0 }
 0x261   :  { %v1515_v52 = vadd.f32 %v4109_v37, %v1514_v51  ;;  %3379 = vmatprep.mubr.msk.f32.mxu0 %vm1888_vm2, %v1815_v48  ;;  %v1818_v55 = vmax.f32 %v1520_v50, 0.0 }
 0x262   :  { %v3283_v53 = vpop.f32.mrf.mxu0  ;;  %3380 = vmatmul.mubr.msk.f32.gmra.mxu0 %vm1888_vm2, %v1816_v49 }
 0x263   :  { %v1817_v54 = vmax.f32 %v1515_v52, 0.0  ;;  %v1530_v56 = vadd.f32 %v3283_v53, %v4109_v37 }
 0x264   :  { %v1524_v57 = vpop.f32.mrf.mxu0 }
 0x265   :  { %v1525_v58 = vadd.f32 %v4109_v37, %v1524_v57  ;;  %3382 = vmatprep.mubr.msk.f32.mxu0 %vm1888_vm2, %v1817_v54  ;;  %v1820_v61 = vmax.f32 %v1530_v56, 0.0 }
 0x266   :  { %v3286_v59 = vpop.f32.mrf.mxu0  ;;  %3383 = vmatmul.mubr.msk.f32.gmra.mxu0 %vm1888_vm2, %v1818_v55 }
 0x267   :  { %v1819_v60 = vmax.f32 %v1525_v58, 0.0  ;;  %v1540_v62 = vadd.f32 %v3286_v59, %v4109_v37 }
 0x268   :  { %v1534_v63 = vpop.f32.mrf.mxu0 }
 0x269   :  { %v1535_v0 = vadd.f32 %v4109_v37, %v1534_v63  ;;  %3385 = vmatprep.mubr.msk.f32.mxu1 %vm1888_vm2, %v1819_v60  ;;  %v1822_v3 = vmax.f32 %v1540_v62, 0.0 }
 0x26a   :  { %v3289_v1 = vpop.f32.mrf.mxu0  ;;  %3386 = vmatmul.mubr.msk.f32.vlgmr.msra.gmra.mxu1 %vm1888_vm2, %v1820_v61 }
 0x26b   :  { %v1821_v2 = vmax.f32 %v1535_v0, 0.0  ;;  %v1550_v4 = vadd.f32 %v3289_v1, %v4109_v37 }
 0x26c   :  { %v1544_v5 = vpop.f32.mrf.mxu0 }
 0x26d   :  { %v1545_v6 = vadd.f32 %v4109_v37, %v1544_v5  ;;  %3388 = vmatprep.mubr.msk.f32.mxu1 %vm1888_vm2, %v1821_v2  ;;  %v1824_v9 = vmax.f32 %v1550_v4, 0.0 }
 0x26e   :  { %v3292_v7 = vpop.f32.mrf.mxu0  ;;  %3389 = vmatmul.mubr.msk.f32.gmra.mxu1 %vm1888_vm2, %v1822_v3 }
 0x26f   :  { %v1823_v8 = vmax.f32 %v1545_v6, 0.0  ;;  %v1560_v10 = vadd.f32 %v3292_v7, %v4109_v37 }
 0x270   :  { %v1554_v11 = vpop.f32.mrf.mxu0 }
 0x271   :  { %v1555_v12 = vadd.f32 %v4109_v37, %v1554_v11  ;;  %3391 = vmatprep.mubr.msk.f32.mxu1 %vm1888_vm2, %v1823_v8  ;;  %v1826_v15 = vmax.f32 %v1560_v10, 0.0 }
 0x272   :  { %v3295_v13 = vpop.f32.mrf.mxu0  ;;  %3392 = vmatmul.mubr.msk.f32.gmra.mxu1 %vm1888_vm2, %v1824_v9 }
 0x273   :  { %v1825_v14 = vmax.f32 %v1555_v12, 0.0  ;;  %v1570_v16 = vadd.f32 %v3295_v13, %v4109_v37 }
 0x274   :  { %v1564_v17 = vpop.f32.mrf.mxu0 }
 0x275   :  { %v1565_v18 = vadd.f32 %v4109_v37, %v1564_v17  ;;  %3394 = vmatprep.mubr.msk.f32.mxu1 %vm1888_vm2, %v1825_v14  ;;  %v1828_v22 = vmax.f32 %v1570_v16, 0.0 }
 0x276   :  { %v3298_v19 = vpop.f32.mrf.mxu0  ;;  %3395 = vmatmul.mubr.msk.f32.gmra.mxu1 %vm1888_vm2, %v1826_v15 }
 0x277   :  { %v1827_v20 = vmax.f32 %v1565_v18, 0.0  ;;  %v1580_v23 = vadd.f32 %v3298_v19, %v4109_v37 }
 0x278   :  { %v1574_v24 = vpop.f32.mrf.mxu0 }
 0x279   :  { %v1575_v25 = vadd.f32 %v4109_v37, %v1574_v24  ;;  %3397 = vmatprep.mubr.msk.f32.mxu1 %vm1888_vm2, %v1827_v20  ;;  %v1830_v28 = vmax.f32 %v1580_v23, 0.0 }
 0x27a   :  { %v3301_v26 = vpop.f32.mrf.mxu0  ;;  %3398 = vmatmul.mubr.msk.f32.gmra.mxu1 %vm1888_vm2, %v1828_v22 }
 0x27b   :  { %v1829_v27 = vmax.f32 %v1575_v25, 0.0  ;;  %v1590_v29 = vadd.f32 %v3301_v26, %v4109_v37 }
 0x27c   :  { %v1584_v30 = vpop.f32.mrf.mxu0 }
 0x27d   :  { %v1585_v31 = vadd.f32 %v4109_v37, %v1584_v30  ;;  %3400 = vmatprep.mubr.msk.f32.mxu1 %vm1888_vm2, %v1829_v27  ;;  %v1832_v34 = vmax.f32 %v1590_v29, 0.0 }
 0x27e   :  { %v3304_v32 = vpop.f32.mrf.mxu0  ;;  %3401 = vmatmul.mubr.msk.f32.gmra.mxu1 %vm1888_vm2, %v1830_v28 }
 0x27f   :  { %v1831_v33 = vmax.f32 %v1585_v31, 0.0  ;;  %v1600_v35 = vadd.f32 %v3304_v32, %v4109_v37 }
 0x280   :  { %v1594_v36 = vpop.f32.mrf.mxu0 }
 0x281   :  { %v1595_v38 = vadd.f32 %v4109_v37, %v1594_v36  ;;  %3403 = vmatprep.mubr.msk.f32.mxu1 %vm1888_vm2, %v1831_v33  ;;  %v1834_v21 = vmax.f32 %v1600_v35, 0.0 }
 0x282   :  { %v3307_v39 = vpop.f32.mrf.mxu0  ;;  %3404 = vmatmul.mubr.msk.f32.gmra.mxu1 %vm1888_vm2, %v1832_v34 }
 0x283   :  { %v1833_v40 = vmax.f32 %v1595_v38, 0.0  ;;  %v1610_v41 = vadd.f32 %v3307_v39, %v4109_v37 }
 0x284   :  { %v1604_v42 = vpop.f32.mrf.mxu0 }
 0x285   :  { %v1605_v43 = vadd.f32 %v4109_v37, %v1604_v42  ;;  %3406 = vmatprep.mubr.msk.f32.mxu1 %vm1888_vm2, %v1833_v40  ;;  %v1836_v46 = vmax.f32 %v1610_v41, 0.0 }
 0x286   :  { %v3310_v44 = vpop.f32.mrf.mxu0  ;;  %3407 = vmatmul.mubr.msk.f32.gmra.mxu1 %vm1888_vm2, %v1834_v21 }
 0x287   :  { %v1835_v45 = vmax.f32 %v1605_v43, 0.0  ;;  %v1620_v47 = vadd.f32 %v3310_v44, %v4109_v37 }
 0x288   :  { %v1614_v48 = vpop.f32.mrf.mxu0 }
 0x289   :  { %v1615_v49 = vadd.f32 %v4109_v37, %v1614_v48  ;;  %3409 = vmatprep.mubr.msk.f32.mxu1 %vm1888_vm2, %v1835_v45  ;;  %v1838_v52 = vmax.f32 %v1620_v47, 0.0 }
 0x28a   :  { %v3313_v50 = vpop.f32.mrf.mxu0  ;;  %3410 = vmatmul.mubr.msk.f32.gmra.mxu1 %vm1888_vm2, %v1836_v46 }
 0x28b   :  { %v1837_v51 = vmax.f32 %v1615_v49, 0.0  ;;  %v1630_v53 = vadd.f32 %v3313_v50, %v4109_v37 }
 0x28c   :  { %v1624_v54 = vpop.f32.mrf.mxu0 }
 0x28d   :  { %v1625_v55 = vadd.f32 %v4109_v37, %v1624_v54  ;;  %3412 = vmatprep.mubr.msk.f32.mxu1 %vm1888_vm2, %v1837_v51  ;;  %v1840_v58 = vmax.f32 %v1630_v53, 0.0 }
 0x28e   :  { %v3316_v56 = vpop.f32.mrf.mxu0  ;;  %3413 = vmatmul.mubr.msk.f32.gmra.mxu1 %vm1888_vm2, %v1838_v52 }
 0x28f   :  { %v1839_v57 = vmax.f32 %v1625_v55, 0.0  ;;  %v1640_v59 = vadd.f32 %v3316_v56, %v4109_v37 }
 0x290   :  { %v1634_v60 = vpop.f32.mrf.mxu0 }
 0x291   :  { %v1635_v61 = vadd.f32 %v4109_v37, %v1634_v60  ;;  %3415 = vmatprep.mubr.msk.f32.mxu1 %vm1888_vm2, %v1839_v57  ;;  %v1842_v0 = vmax.f32 %v1640_v59, 0.0 }
 0x292   :  { %v3319_v62 = vpop.f32.mrf.mxu0  ;;  %3416 = vmatmul.mubr.msk.f32.gmra.mxu1 %vm1888_vm2, %v1840_v58 }
 0x293   :  { %v1841_v63 = vmax.f32 %v1635_v61, 0.0  ;;  %v1650_v1 = vadd.f32 %v3319_v62, %v4109_v37 }
 0x294   :  { %v1644_v2 = vpop.f32.mrf.mxu0 }
 0x295   :  { %v1645_v3 = vadd.f32 %v4109_v37, %v1644_v2  ;;  %3418 = vmatprep.mubr.msk.f32.mxu1 %vm1888_vm2, %v1841_v63  ;;  %v1844_v6 = vmax.f32 %v1650_v1, 0.0 }
 0x296   :  { %v3322_v4 = vpop.f32.mrf.mxu0  ;;  %3419 = vmatmul.mubr.msk.f32.gmra.mxu1 %vm1888_vm2, %v1842_v0 }
 0x297   :  { %v1843_v5 = vmax.f32 %v1645_v3, 0.0  ;;  %v1660_v7 = vadd.f32 %v3322_v4, %v4109_v37 }
 0x298   :  { %v1654_v8 = vpop.f32.mrf.mxu0 }
 0x299   :  { %v1655_v9 = vadd.f32 %v4109_v37, %v1654_v8  ;;  %3421 = vmatprep.mubr.msk.f32.mxu1 %vm1888_vm2, %v1843_v5  ;;  %v1846_v12 = vmax.f32 %v1660_v7, 0.0 }
 0x29a   :  { %v3325_v10 = vpop.f32.mrf.mxu0  ;;  %3422 = vmatmul.mubr.msk.f32.gmra.mxu1 %vm1888_vm2, %v1844_v6 }
 0x29b   :  { %v1845_v11 = vmax.f32 %v1655_v9, 0.0  ;;  %v1670_v13 = vadd.f32 %v3325_v10, %v4109_v37 }
 0x29c   :  { %v1664_v14 = vpop.f32.mrf.mxu0 }
 0x29d   :  { %v1665_v15 = vadd.f32 %v4109_v37, %v1664_v14  ;;  %3424 = vmatprep.mubr.msk.f32.mxu1 %vm1888_vm2, %v1845_v11  ;;  %v1848_v18 = vmax.f32 %v1670_v13, 0.0 }
 0x29e   :  { %v3328_v16 = vpop.f32.mrf.mxu0  ;;  %3425 = vmatmul.mubr.msk.f32.gmra.mxu1 %vm1888_vm2, %v1846_v12 }
 0x29f   :  { %v1847_v17 = vmax.f32 %v1665_v15, 0.0  ;;  %v1680_v19 = vadd.f32 %v3328_v16, %v4109_v37 }
 0x2a0   :  { %v1674_v20 = vpop.f32.mrf.mxu0 }
 0x2a1   :  { %v1675_v22 = vadd.f32 %v4109_v37, %v1674_v20  ;;  %3427 = vmatprep.mubr.msk.f32.mxu1 %vm1888_vm2, %v1847_v17  ;;  %v1850_v25 = vmax.f32 %v1680_v19, 0.0 }
 0x2a2   :  { %v3331_v23 = vpop.f32.mrf.mxu0  ;;  %3428 = vmatmul.mubr.msk.f32.gmra.mxu1 %vm1888_vm2, %v1848_v18 }
 0x2a3   :  { %v1849_v24 = vmax.f32 %v1675_v22, 0.0  ;;  %v1690_v26 = vadd.f32 %v3331_v23, %v4109_v37 }
 0x2a4   :  { %v1684_v27 = vpop.f32.mrf.mxu0 }
 0x2a5   :  { %v1685_v28 = vadd.f32 %v4109_v37, %v1684_v27  ;;  %3430 = vmatprep.mubr.msk.f32.mxu1 %vm1888_vm2, %v1849_v24  ;;  %v1852_v31 = vmax.f32 %v1690_v26, 0.0 }
 0x2a6   :  { %v3334_v29 = vpop.f32.mrf.mxu0  ;;  %3431 = vmatmul.mubr.msk.f32.gmra.mxu1 %vm1888_vm2, %v1850_v25 }
 0x2a7   :  { %v1851_v30 = vmax.f32 %v1685_v28, 0.0  ;;  %v1700_v32 = vadd.f32 %v3334_v29, %v4109_v37 }
 0x2a8   :  { %v1694_v33 = vpop.f32.mrf.mxu0 }
 0x2a9   :  { %v1695_v34 = vadd.f32 %v4109_v37, %v1694_v33  ;;  %3433 = vmatprep.mubr.msk.f32.mxu1 %vm1888_vm2, %v1851_v30  ;;  %v1854_v38 = vmax.f32 %v1700_v32, 0.0 }
 0x2aa   :  { %v3337_v35 = vpop.f32.mrf.mxu0  ;;  %3434 = vmatmul.mubr.msk.f32.gmra.mxu1 %vm1888_vm2, %v1852_v31 }
 0x2ab   :  { %v1853_v36 = vmax.f32 %v1695_v34, 0.0  ;;  %v1710_v39 = vadd.f32 %v3337_v35, %v4109_v37 }
 0x2ac   :  { %v1704_v40 = vpop.f32.mrf.mxu0 }
 0x2ad   :  { %v1705_v21 = vadd.f32 %v4109_v37, %v1704_v40  ;;  %3436 = vmatprep.mubr.msk.f32.mxu1 %vm1888_vm2, %v1853_v36  ;;  %v1856_v43 = vmax.f32 %v1710_v39, 0.0 }
 0x2ae   :  { %v3340_v41 = vpop.f32.mrf.mxu0  ;;  %3437 = vmatmul.mubr.msk.f32.gmra.mxu1 %vm1888_vm2, %v1854_v38 }
 0x2af   :  { %v1855_v42 = vmax.f32 %v1705_v21, 0.0  ;;  %v1720_v44 = vadd.f32 %v3340_v41, %v4109_v37  ;;  %v4242_v21 = vld [vmem:[%s4319_s8] ss:$0 sm:$0xff]  ;;  %s3505_s8 = smov [#allocation2]  }
 0x2b0   :  { %v1714_v45 = vpop.f32.mrf.mxu0  ;;  %s2535_s1 = sshll.u32 %s3505_s8, 4  ;;  %s2536_s1 = int_to_ptr.vmem [resolvable:$true] %s2535_s1 }
 0x2b1   :  { %v1715_v46 = vadd.f32 %v4109_v37, %v1714_v45  ;;  %3439 = vmatprep.mubr.msk.f32.mxu1 %vm1888_vm2, %v1855_v42  ;;  %v1858_v49 = vmax.f32 %v1720_v44, 0.0  ;;  %s3483_s19 = scalar_lea.vmem %s2536_s1, 8192  ;;  %p3488_p1 = scmp.lt.s32.totalorder %s2536_s1, %s2536_s1 }
 0x2b2   :  { %v3343_v47 = vpop.f32.mrf.mxu0  ;;  %3440 = vmatmul.mubr.msk.f32.gmra.mxu1 %vm1888_vm2, %v1856_v43  ;;  %p3484_p0 = scmp.ne.s32.totalorder %s2536_s1, %s3483_s19  ;;  %p3489_p2 = scmp.lt.s32.totalorder %s3483_s19, %s3483_s19 }
 0x2b3   :  { %v1857_v48 = vmax.f32 %v1715_v46, 0.0  ;;  %v1730_v50 = vadd.f32 %v3343_v47, %v4109_v37 }
 0x2b4   :  { %v1724_v51 = vpop.f32.mrf.mxu0  ;;  %p3490_p3 = por %p3489_p2, %p3488_p1 }
 0x2b5   :  { %v1725_v52 = vadd.f32 %v4109_v37, %v1724_v51  ;;  %3442 = vmatprep.mubr.msk.f32.mxu1 %vm1888_vm2, %v1857_v48  ;;  %v1860_v55 = vmax.f32 %v1730_v50, 0.0 }
 0x2b6   :  { %v3346_v53 = vpop.f32.mrf.mxu0  ;;  %3443 = vmatmul.mubr.msk.f32.gmra.mxu1 %vm1888_vm2, %v1858_v49  ;;  %p3491_p4 = pnand %p3490_p3, %p3484_p0 }
 0x2b7   :  { %v1859_v54 = vmax.f32 %v1725_v52, 0.0  ;;  %v1740_v56 = vadd.f32 %v3346_v53, %v4109_v37 }
 0x2b8   :  { %v1734_v57 = vpop.f32.mrf.mxu0 }
 0x2b9   :  { %v1735_v58 = vadd.f32 %v4109_v37, %v1734_v57  ;;  %3445 = vmatprep.mubr.msk.f32.mxu1 %vm1888_vm2, %v1859_v54  ;;  %v1862_v61 = vmax.f32 %v1740_v56, 0.0 }
 0x2ba   :  { %v3349_v59 = vpop.f32.mrf.mxu0  ;;  %3446 = vmatmul.mubr.msk.f32.gmra.mxu1 %vm1888_vm2, %v1860_v55 }
 0x2bb   :  { %v1861_v60 = vmax.f32 %v1735_v58, 0.0  ;;  %v1750_v62 = vadd.f32 %v3349_v59, %v4109_v37 }
 0x2bc   :  { %v1744_v63 = vpop.f32.mrf.mxu0 }
 0x2bd   :  { %v1745_v0 = vadd.f32 %v4109_v37, %v1744_v63  ;;  %3448 = vmatprep.mubr.msk.f32.mxu1 %vm1888_vm2, %v1861_v60  ;;  %v1864_v3 = vmax.f32 %v1750_v62, 0.0 }
 0x2be   :  { %v3352_v1 = vpop.f32.mrf.mxu0  ;;  %3449 = vmatmul.mubr.msk.f32.gmra.mxu1 %vm1888_vm2, %v1862_v61 }
 0x2bf   :  { %v1863_v2 = vmax.f32 %v1745_v0, 0.0  ;;  %v1760_v4 = vadd.f32 %v3352_v1, %v4109_v37 }
 0x2c0   :  { %v1754_v5 = vpop.f32.mrf.mxu0 }
 0x2c1   :  { %v1755_v6 = vadd.f32 %v4109_v37, %v1754_v5  ;;  %3451 = vmatprep.mubr.msk.f32.mxu1 %vm1888_vm2, %v1863_v2  ;;  %v1866_v9 = vmax.f32 %v1760_v4, 0.0 }
 0x2c2   :  { %v3355_v7 = vpop.f32.mrf.mxu0  ;;  %3452 = vmatmul.mubr.msk.f32.gmra.mxu1 %vm1888_vm2, %v1864_v3 }
 0x2c3   :  { %v1865_v8 = vmax.f32 %v1755_v6, 0.0  ;;  %v1770_v10 = vadd.f32 %v3355_v7, %v4109_v37 }
 0x2c4   :  { %v1764_v11 = vpop.f32.mrf.mxu0 }
 0x2c5   :  { %v1765_v12 = vadd.f32 %v4109_v37, %v1764_v11  ;;  %3454 = vmatprep.mubr.msk.f32.mxu1 %vm1888_vm2, %v1865_v8  ;;  %v1868_v15 = vmax.f32 %v1770_v10, 0.0 }
 0x2c6   :  { %v3358_v13 = vpop.f32.mrf.mxu0  ;;  %3455 = vmatmul.mubr.msk.f32.gmra.mxu1 %vm1888_vm2, %v1866_v9 }
 0x2c7   :  { %v1867_v14 = vmax.f32 %v1765_v12, 0.0  ;;  %v1780_v16 = vadd.f32 %v3358_v13, %v4109_v37 }
 0x2c8   :  { %v1774_v17 = vpop.f32.mrf.mxu0 }
 0x2c9   :  { %v1775_v18 = vadd.f32 %v4109_v37, %v1774_v17  ;;  %3457 = vmatprep.mubr.msk.f32.mxu1 %vm1888_vm2, %v1867_v14  ;;  %v1870_v22 = vmax.f32 %v1780_v16, 0.0 }
 0x2ca   :  { %v3361_v19 = vpop.f32.mrf.mxu0  ;;  %3458 = vmatmul.mubr.msk.f32.gmra.mxu1 %vm1888_vm2, %v1868_v15 }
 0x2cb   :  { %v1869_v20 = vmax.f32 %v1775_v18, 0.0  ;;  %v1790_v23 = vadd.f32 %v3361_v19, %v4109_v37 }
 0x2cc   :  { %v1784_v24 = vpop.f32.mrf.mxu0 }
 0x2cd   :  { %v1785_v25 = vadd.f32 %v4109_v37, %v1784_v24  ;;  %3460 = vmatprep.mubr.msk.f32.mxu1 %vm1888_vm2, %v1869_v20  ;;  %v1872_v28 = vmax.f32 %v1790_v23, 0.0 }
 0x2ce   :  { %v3364_v26 = vpop.f32.mrf.mxu0  ;;  %3461 = vmatmul.mubr.msk.f32.gmra.mxu1 %vm1888_vm2, %v1870_v22 }
 0x2cf   :  { %v1871_v27 = vmax.f32 %v1785_v25, 0.0  ;;  %v1800_v29 = vadd.f32 %v3364_v26, %v4109_v37 }
 0x2d0   :  { %v1794_v30 = vpop.f32.mrf.mxu0 }
 0x2d1   :  { %v1795_v31 = vadd.f32 %v4109_v37, %v1794_v30  ;;  %3463 = vmatprep.mubr.msk.f32.mxu1 %vm1888_vm2, %v1871_v27  ;;  %v1874_v34 = vmax.f32 %v1800_v29, 0.0 }
 0x2d2   :  { %v3367_v32 = vpop.f32.mrf.mxu0  ;;  %3464 = vmatmul.mubr.msk.f32.gmra.mxu1 %vm1888_vm2, %v1872_v28 }
 0x2d3   :  { %v1873_v33 = vmax.f32 %v1795_v31, 0.0  ;;  %v1810_v35 = vadd.f32 %v3367_v32, %v4109_v37 }
 0x2d4   :  { %v1804_v36 = vpop.f32.mrf.mxu0 }
 0x2d5   :  { %v1805_v38 = vadd.f32 %v4109_v37, %v1804_v36  ;;  %3466 = vmatprep.mubr.msk.f32.mxu1 %vm1888_vm2, %v1873_v33  ;;  %v1876_v40 = vmax.f32 %v1810_v35, 0.0 }
 0x2d6   :  { %3467 = vmatmul.mubr.msk.f32.gmra.mxu1 %vm1888_vm2, %v1874_v34 }
 0x2d7   :  { %v1875_v39 = vmax.f32 %v1805_v38, 0.0 }
 0x2d9   :  { %3469 = vmatprep.mubr.msk.f32.mxu1 %vm1888_vm2, %v1875_v39 }
 0x2da   :  { %3470 = vmatmul.mubr.msk.f32.gmra.mxu1 %vm1888_vm2, %v1876_v40 }
 0x31e   :  { %v3378_v41 = vpop.f32.mrf.mxu0 }
 0x31f   :  { %v2153_v42 = vadd.f32 %v3378_v41, %v4242_v21 }
 0x320   :  { %v2147_v43 = vpop.f32.mrf.mxu0 }
 0x321   :  { %2467 = vst [vmem:[#allocation2 + $0x8] sm:$0xff] %v2153_v42  ;;  %v2148_v37 = vadd.f32 %v4242_v21, %v2147_v43 }
 0x322   :  { %v3381_v44 = vpop.f32.mrf.mxu0 }
 0x323   :  { %2466 = vst [vmem:[#allocation2] sm:$0xff] %v2148_v37  ;;  %v2163_v45 = vadd.f32 %v3381_v44, %v4242_v21 }
 0x324   :  { %v2157_v46 = vpop.f32.mrf.mxu0 }
 0x325   :  { %2469 = vst [vmem:[#allocation2 + $0x18] sm:$0xff] %v2163_v45  ;;  %v2158_v47 = vadd.f32 %v4242_v21, %v2157_v46 }
 0x326   :  { %v3384_v48 = vpop.f32.mrf.mxu0 }
 0x327   :  { %2468 = vst [vmem:[#allocation2 + $0x10] sm:$0xff] %v2158_v47  ;;  %v2173_v49 = vadd.f32 %v3384_v48, %v4242_v21 }
 0x328   :  { %v2167_v50 = vpop.f32.mrf.mxu0 }
 0x329   :  { %2471 = vst [vmem:[#allocation2 + $0x28] sm:$0xff] %v2173_v49  ;;  %v2168_v51 = vadd.f32 %v4242_v21, %v2167_v50 }
 0x32a   :  { %v3387_v52 = vpop.f32.mrf.mxu1 }
 0x32b   :  { %2470 = vst [vmem:[#allocation2 + $0x20] sm:$0xff] %v2168_v51  ;;  %v2183_v53 = vadd.f32 %v3387_v52, %v4242_v21 }
 0x32c   :  { %v2177_v54 = vpop.f32.mrf.mxu1 }
 0x32d   :  { %2473 = vst [vmem:[#allocation2 + $0x38] sm:$0xff] %v2183_v53  ;;  %v2178_v55 = vadd.f32 %v4242_v21, %v2177_v54 }
 0x32e   :  { %v3390_v56 = vpop.f32.mrf.mxu1 }
 0x32f   :  { %2472 = vst [vmem:[#allocation2 + $0x30] sm:$0xff] %v2178_v55  ;;  %v2193_v57 = vadd.f32 %v3390_v56, %v4242_v21 }
 0x330   :  { %v2187_v58 = vpop.f32.mrf.mxu1 }
 0x331   :  { %2475 = vst [vmem:[#allocation2 + $0x48] sm:$0xff] %v2193_v57  ;;  %v2188_v59 = vadd.f32 %v4242_v21, %v2187_v58 }
 0x332   :  { %v3393_v60 = vpop.f32.mrf.mxu1 }
 0x333   :  { %2474 = vst [vmem:[#allocation2 + $0x40] sm:$0xff] %v2188_v59  ;;  %v2203_v61 = vadd.f32 %v3393_v60, %v4242_v21 }
 0x334   :  { %v2197_v62 = vpop.f32.mrf.mxu1 }
 0x335   :  { %2477 = vst [vmem:[#allocation2 + $0x58] sm:$0xff] %v2203_v61  ;;  %v2198_v63 = vadd.f32 %v4242_v21, %v2197_v62 }
 0x336   :  { %v3396_v0 = vpop.f32.mrf.mxu1 }
 0x337   :  { %2476 = vst [vmem:[#allocation2 + $0x50] sm:$0xff] %v2198_v63  ;;  %v2213_v1 = vadd.f32 %v3396_v0, %v4242_v21 }
 0x338   :  { %v2207_v2 = vpop.f32.mrf.mxu1 }
 0x339   :  { %2479 = vst [vmem:[#allocation2 + $0x68] sm:$0xff] %v2213_v1  ;;  %v2208_v3 = vadd.f32 %v4242_v21, %v2207_v2 }
 0x33a   :  { %v3399_v4 = vpop.f32.mrf.mxu1 }
 0x33b   :  { %2478 = vst [vmem:[#allocation2 + $0x60] sm:$0xff] %v2208_v3  ;;  %v2223_v5 = vadd.f32 %v3399_v4, %v4242_v21 }
 0x33c   :  { %v2217_v6 = vpop.f32.mrf.mxu1 }
 0x33d   :  { %2481 = vst [vmem:[#allocation2 + $0x78] sm:$0xff] %v2223_v5  ;;  %v2218_v7 = vadd.f32 %v4242_v21, %v2217_v6 }
 0x33e   :  { %v3402_v8 = vpop.f32.mrf.mxu1 }
 0x33f   :  { %2480 = vst [vmem:[#allocation2 + $0x70] sm:$0xff] %v2218_v7  ;;  %v2233_v9 = vadd.f32 %v3402_v8, %v4242_v21 }
 0x340   :  { %v2227_v10 = vpop.f32.mrf.mxu1 }
 0x341   :  { %2483 = vst [vmem:[#allocation2 + $0x88] sm:$0xff] %v2233_v9  ;;  %v2228_v11 = vadd.f32 %v4242_v21, %v2227_v10 }
 0x342   :  { %v3405_v12 = vpop.f32.mrf.mxu1 }
 0x343   :  { %2482 = vst [vmem:[#allocation2 + $0x80] sm:$0xff] %v2228_v11  ;;  %v2243_v13 = vadd.f32 %v3405_v12, %v4242_v21 }
 0x344   :  { %v2237_v14 = vpop.f32.mrf.mxu1 }
 0x345   :  { %2485 = vst [vmem:[#allocation2 + $0x98] sm:$0xff] %v2243_v13  ;;  %v2238_v15 = vadd.f32 %v4242_v21, %v2237_v14 }
 0x346   :  { %v3408_v16 = vpop.f32.mrf.mxu1 }
 0x347   :  { %2484 = vst [vmem:[#allocation2 + $0x90] sm:$0xff] %v2238_v15  ;;  %v2253_v17 = vadd.f32 %v3408_v16, %v4242_v21 }
 0x348   :  { %v2247_v18 = vpop.f32.mrf.mxu1 }
 0x349   :  { %2487 = vst [vmem:[#allocation2 + $0xa8] sm:$0xff] %v2253_v17  ;;  %v2248_v19 = vadd.f32 %v4242_v21, %v2247_v18 }
 0x34a   :  { %v3411_v20 = vpop.f32.mrf.mxu1 }
 0x34b   :  { %2486 = vst [vmem:[#allocation2 + $0xa0] sm:$0xff] %v2248_v19  ;;  %v2263_v22 = vadd.f32 %v3411_v20, %v4242_v21 }
 0x34c   :  { %v2257_v23 = vpop.f32.mrf.mxu1 }
 0x34d   :  { %2489 = vst [vmem:[#allocation2 + $0xb8] sm:$0xff] %v2263_v22  ;;  %v2258_v24 = vadd.f32 %v4242_v21, %v2257_v23 }
 0x34e   :  { %v3414_v25 = vpop.f32.mrf.mxu1 }
 0x34f   :  { %2488 = vst [vmem:[#allocation2 + $0xb0] sm:$0xff] %v2258_v24  ;;  %v2273_v26 = vadd.f32 %v3414_v25, %v4242_v21 }
 0x350   :  { %v2267_v27 = vpop.f32.mrf.mxu1 }
 0x351   :  { %2491 = vst [vmem:[#allocation2 + $0xc8] sm:$0xff] %v2273_v26  ;;  %v2268_v28 = vadd.f32 %v4242_v21, %v2267_v27 }
 0x352   :  { %v3417_v29 = vpop.f32.mrf.mxu1 }
 0x353   :  { %2490 = vst [vmem:[#allocation2 + $0xc0] sm:$0xff] %v2268_v28  ;;  %v2283_v30 = vadd.f32 %v3417_v29, %v4242_v21 }
 0x354   :  { %v2277_v31 = vpop.f32.mrf.mxu1 }
 0x355   :  { %2493 = vst [vmem:[#allocation2 + $0xd8] sm:$0xff] %v2283_v30  ;;  %v2278_v32 = vadd.f32 %v4242_v21, %v2277_v31 }
 0x356   :  { %v3420_v33 = vpop.f32.mrf.mxu1 }
 0x357   :  { %2492 = vst [vmem:[#allocation2 + $0xd0] sm:$0xff] %v2278_v32  ;;  %v2293_v34 = vadd.f32 %v3420_v33, %v4242_v21 }
 0x358   :  { %v2287_v35 = vpop.f32.mrf.mxu1 }
 0x359   :  { %2495 = vst [vmem:[#allocation2 + $0xe8] sm:$0xff] %v2293_v34  ;;  %v2288_v36 = vadd.f32 %v4242_v21, %v2287_v35 }
 0x35a   :  { %v3423_v38 = vpop.f32.mrf.mxu1 }
 0x35b   :  { %2494 = vst [vmem:[#allocation2 + $0xe0] sm:$0xff] %v2288_v36  ;;  %v2303_v39 = vadd.f32 %v3423_v38, %v4242_v21 }
 0x35c   :  { %v2297_v40 = vpop.f32.mrf.mxu1 }
 0x35d   :  { %2497 = vst [vmem:[#allocation2 + $0xf8] sm:$0xff] %v2303_v39  ;;  %v2298_v41 = vadd.f32 %v4242_v21, %v2297_v40 }
 0x35e   :  { %v3426_v42 = vpop.f32.mrf.mxu1 }
 0x35f   :  { %2496 = vst [vmem:[#allocation2 + $0xf0] sm:$0xff] %v2298_v41  ;;  %v2313_v43 = vadd.f32 %v3426_v42, %v4242_v21 }
 0x360   :  { %v2307_v37 = vpop.f32.mrf.mxu1 }
 0x361   :  { %2499 = vst [vmem:[#allocation2 + $0x108] sm:$0xff] %v2313_v43  ;;  %v2308_v44 = vadd.f32 %v4242_v21, %v2307_v37 }
 0x362   :  { %v3429_v45 = vpop.f32.mrf.mxu1 }
 0x363   :  { %2498 = vst [vmem:[#allocation2 + $0x100] sm:$0xff] %v2308_v44  ;;  %v2323_v46 = vadd.f32 %v3429_v45, %v4242_v21 }
 0x364   :  { %v2317_v47 = vpop.f32.mrf.mxu1 }
 0x365   :  { %2501 = vst [vmem:[#allocation2 + $0x118] sm:$0xff] %v2323_v46  ;;  %v2318_v48 = vadd.f32 %v4242_v21, %v2317_v47 }
 0x366   :  { %v3432_v49 = vpop.f32.mrf.mxu1 }
 0x367   :  { %2500 = vst [vmem:[#allocation2 + $0x110] sm:$0xff] %v2318_v48  ;;  %v2333_v50 = vadd.f32 %v3432_v49, %v4242_v21 }
 0x368   :  { %v2327_v51 = vpop.f32.mrf.mxu1 }
 0x369   :  { %2503 = vst [vmem:[#allocation2 + $0x128] sm:$0xff] %v2333_v50  ;;  %v2328_v52 = vadd.f32 %v4242_v21, %v2327_v51 }
 0x36a   :  { %v3435_v53 = vpop.f32.mrf.mxu1 }
 0x36b   :  { %2502 = vst [vmem:[#allocation2 + $0x120] sm:$0xff] %v2328_v52  ;;  %v2343_v54 = vadd.f32 %v3435_v53, %v4242_v21 }
 0x36c   :  { %v2337_v55 = vpop.f32.mrf.mxu1 }
 0x36d   :  { %2505 = vst [vmem:[#allocation2 + $0x138] sm:$0xff] %v2343_v54  ;;  %v2338_v56 = vadd.f32 %v4242_v21, %v2337_v55 }
 0x36e   :  { %v3438_v57 = vpop.f32.mrf.mxu1 }
 0x36f   :  { %2504 = vst [vmem:[#allocation2 + $0x130] sm:$0xff] %v2338_v56  ;;  %v2353_v58 = vadd.f32 %v3438_v57, %v4242_v21 }
 0x370   :  { %v2347_v59 = vpop.f32.mrf.mxu1 }
 0x371   :  { %2507 = vst [vmem:[#allocation2 + $0x148] sm:$0xff] %v2353_v58  ;;  %v2348_v60 = vadd.f32 %v4242_v21, %v2347_v59 }
 0x372   :  { %v3441_v61 = vpop.f32.mrf.mxu1 }
 0x373   :  { %2506 = vst [vmem:[#allocation2 + $0x140] sm:$0xff] %v2348_v60  ;;  %v2363_v62 = vadd.f32 %v3441_v61, %v4242_v21 }
 0x374   :  { %v2357_v63 = vpop.f32.mrf.mxu1 }
 0x375   :  { %2509 = vst [vmem:[#allocation2 + $0x158] sm:$0xff] %v2363_v62  ;;  %v2358_v0 = vadd.f32 %v4242_v21, %v2357_v63 }
 0x376   :  { %v3444_v1 = vpop.f32.mrf.mxu1 }
 0x377   :  { %2508 = vst [vmem:[#allocation2 + $0x150] sm:$0xff] %v2358_v0  ;;  %v2373_v2 = vadd.f32 %v3444_v1, %v4242_v21 }
 0x378   :  { %v2367_v3 = vpop.f32.mrf.mxu1 }
 0x379   :  { %2511 = vst [vmem:[#allocation2 + $0x168] sm:$0xff] %v2373_v2  ;;  %v2368_v4 = vadd.f32 %v4242_v21, %v2367_v3 }
 0x37a   :  { %v3447_v5 = vpop.f32.mrf.mxu1 }
 0x37b   :  { %2510 = vst [vmem:[#allocation2 + $0x160] sm:$0xff] %v2368_v4  ;;  %v2383_v6 = vadd.f32 %v3447_v5, %v4242_v21 }
 0x37c   :  { %v2377_v7 = vpop.f32.mrf.mxu1 }
 0x37d   :  { %2513 = vst [vmem:[#allocation2 + $0x178] sm:$0xff] %v2383_v6  ;;  %v2378_v8 = vadd.f32 %v4242_v21, %v2377_v7 }
 0x37e   :  { %v3450_v9 = vpop.f32.mrf.mxu1 }
 0x37f   :  { %2512 = vst [vmem:[#allocation2 + $0x170] sm:$0xff] %v2378_v8  ;;  %v2393_v10 = vadd.f32 %v3450_v9, %v4242_v21 }
 0x380   :  { %v2387_v11 = vpop.f32.mrf.mxu1 }
 0x381   :  { %2515 = vst [vmem:[#allocation2 + $0x188] sm:$0xff] %v2393_v10  ;;  %v2388_v12 = vadd.f32 %v4242_v21, %v2387_v11 }
 0x382   :  { %v3453_v13 = vpop.f32.mrf.mxu1 }
 0x383   :  { %2514 = vst [vmem:[#allocation2 + $0x180] sm:$0xff] %v2388_v12  ;;  %v2403_v14 = vadd.f32 %v3453_v13, %v4242_v21 }
 0x384   :  { %v2397_v15 = vpop.f32.mrf.mxu1 }
 0x385   :  { %2517 = vst [vmem:[#allocation2 + $0x198] sm:$0xff] %v2403_v14  ;;  %v2398_v16 = vadd.f32 %v4242_v21, %v2397_v15 }
 0x386   :  { %v3456_v17 = vpop.f32.mrf.mxu1 }
 0x387   :  { %2516 = vst [vmem:[#allocation2 + $0x190] sm:$0xff] %v2398_v16  ;;  %v2413_v18 = vadd.f32 %v3456_v17, %v4242_v21 }
 0x388   :  { %v2407_v19 = vpop.f32.mrf.mxu1 }
 0x389   :  { %2519 = vst [vmem:[#allocation2 + $0x1a8] sm:$0xff] %v2413_v18  ;;  %v2408_v20 = vadd.f32 %v4242_v21, %v2407_v19 }
 0x38a   :  { %v3459_v22 = vpop.f32.mrf.mxu1 }
 0x38b   :  { %2518 = vst [vmem:[#allocation2 + $0x1a0] sm:$0xff] %v2408_v20  ;;  %v2423_v23 = vadd.f32 %v3459_v22, %v4242_v21 }
 0x38c   :  { %v2417_v24 = vpop.f32.mrf.mxu1 }
 0x38d   :  { %2521 = vst [vmem:[#allocation2 + $0x1b8] sm:$0xff] %v2423_v23  ;;  %v2418_v25 = vadd.f32 %v4242_v21, %v2417_v24 }
 0x38e   :  { %v3462_v26 = vpop.f32.mrf.mxu1 }
 0x38f   :  { %2520 = vst [vmem:[#allocation2 + $0x1b0] sm:$0xff] %v2418_v25  ;;  %v2433_v27 = vadd.f32 %v3462_v26, %v4242_v21 }
 0x390   :  { %v2427_v28 = vpop.f32.mrf.mxu1 }
 0x391   :  { %2523 = vst [vmem:[#allocation2 + $0x1c8] sm:$0xff] %v2433_v27  ;;  %v2428_v29 = vadd.f32 %v4242_v21, %v2427_v28 }
 0x392   :  { %v3465_v30 = vpop.f32.mrf.mxu1 }
 0x393   :  { %2522 = vst [vmem:[#allocation2 + $0x1c0] sm:$0xff] %v2428_v29  ;;  %v2443_v31 = vadd.f32 %v3465_v30, %v4242_v21 }
 0x394   :  { %v2437_v32 = vpop.f32.mrf.mxu1 }
 0x395   :  { %2525 = vst [vmem:[#allocation2 + $0x1d8] sm:$0xff] %v2443_v31  ;;  %v2438_v33 = vadd.f32 %v4242_v21, %v2437_v32 }
 0x396   :  { %v3468_v34 = vpop.f32.mrf.mxu1 }
 0x397   :  { %2524 = vst [vmem:[#allocation2 + $0x1d0] sm:$0xff] %v2438_v33  ;;  %v2453_v35 = vadd.f32 %v3468_v34, %v4242_v21 }
 0x398   :  { %v2447_v36 = vpop.f32.mrf.mxu1 }
 0x399   :  { %2527 = vst [vmem:[#allocation2 + $0x1e8] sm:$0xff] %v2453_v35  ;;  %v2448_v38 = vadd.f32 %v4242_v21, %v2447_v36 }
 0x39a   :  { %v3471_v39 = vpop.f32.mrf.mxu1 }
 0x39b   :  { %2526 = vst [vmem:[#allocation2 + $0x1e0] sm:$0xff] %v2448_v38  ;;  %v2463_v40 = vadd.f32 %v3471_v39, %v4242_v21 }
 0x39c   :  { %v2457_v41 = vpop.f32.mrf.mxu1 }
 0x39d   :  { %2529 = vst [vmem:[#allocation2 + $0x1f8] sm:$0xff] %v2463_v40  ;;  %v2458_v42 = vadd.f32 %v4242_v21, %v2457_v41 }
 0x39f   :  { %2528 = vst [vmem:[#allocation2 + $0x1f0] sm:$0xff] %v2458_v42 }
 0x3a0   :  { %3494 = shalt.err (!%p3491_p4)
}
 0x3a1   :  { %s3506_s20 = smov 128   ;;  %s3507_s0 = smov 8  }
 0x3a2   :  { %2541 = dma.vmem_to_hbm [thread:$0]  %s2536_s1, 8192, %s4320_s9, [#allocation3], %s3506_s20, %s3506_s20, %s3507_s0  }
 0x3a3   :  { %3503 = dma.done.wait [#allocation3], 8192  }
 0x3a4   :  { %3504 = vsyncadd [#allocation3], 4294959104 }
 0x3a5   :  { %2545 = vsyncpa [#allocation3], 1 }

</bundles_post_ra>
